<compile_context>
chip_gen: v7x
topology: tpu7x:2x2x1
jax: 0.10.0
libtpu: 0.0.40
codegen_flags: <defaults>
</compile_context>

<pallas_src>
import functools
import math

import jax
import jax.numpy as jnp
from jax.experimental import pallas as pl
from jax.experimental.pallas import tpu as pltpu

LN_EPS = 1e-5            # torch.nn.LayerNorm default

TM = 512                 # dst-row tile (output rows)
TK = 1024                # src / contraction tile of A (multiple of TM); sweep to 2048 on v7x
XS_RESIDENT_BYTES = 8 * 1024 * 1024   # hold x_src fully in VMEM when <= 8 MiB


def _round_up(v, m):
    return ((v + m - 1) // m) * m


def _pick_tiles(n):
    """Pick (np_, tm, tk) so np_ is divisible by both tm and tk, tk % tm == 0."""
    np_min = _round_up(n, 128)
    tm = min(TM, np_min)
    tk = min(TK, np_min)
    tk = max((tk // tm) * tm, tm)
    np_ = _round_up(n, tk)
    return np_, tm, tk


def _pad2(a, rows, cols):
    r, c = a.shape
    if (r, c) == (rows, cols):
        return a
    return jnp.zeros((rows, cols), a.dtype).at[:r, :c].set(a)


def _layernorm_padded(x, gamma, beta, c_valid):
    """Two-pass LayerNorm over the first c_valid lanes of a zero-padded tile.

    Padded lanes of x are exactly zero on entry; gamma/beta are zero in padded
    lanes so the output's padded lanes stay exactly zero.
    """
    c_pad = x.shape[-1]
    inv_c = 1.0 / float(c_valid)
    mu = jnp.sum(x, axis=-1, keepdims=True) * inv_c
    xc = x - mu
    if c_pad != c_valid:
        lane = jax.lax.broadcasted_iota(jnp.int32, x.shape, dimension=x.ndim - 1)
        xc_valid = jnp.where(lane < c_valid, xc, 0.0)
    else:
        xc_valid = xc
    var = jnp.sum(xc_valid * xc_valid, axis=-1, keepdims=True) * inv_c
    return xc * jax.lax.rsqrt(var + LN_EPS) * gamma + beta


def _gin_layer_kernel(c_out_valid, apply_inter_norm, apply_relu, add_residual,
                      xs_resident, tk,
                      eps_ref, a_ref, xs_ref, xd_ref,
                      w1_ref, w2_ref, vecs_ref,
                      o_ref, o_bf16_ref, acc_ref):
    """One CustomGINConv layer + EdgeGNN inter-layer ops, tiled over (rows, K)."""
    k = pl.program_id(1)

    @pl.when(k == 0)
    def _init():
        # acc <- (1 + eps) * x[dst]   (eps from SMEM, x[dst] in f32)
        acc_ref[...] = (1.0 + eps_ref[0, 0]) * xd_ref[...]

    # Sum aggregation over incoming edges: bf16 x bf16 -> f32 on the MXU.
    if xs_resident:
        start = pl.multiple_of(k * tk, tk)
        xs_tile = xs_ref[pl.ds(start, tk), :]
    else:
        xs_tile = xs_ref[...]
    acc_ref[...] += jnp.dot(a_ref[...], xs_tile,
                            preferred_element_type=jnp.float32)

    @pl.when(k == pl.num_programs(1) - 1)
    def _epilogue():
        z = acc_ref[...]
        b1 = vecs_ref[0:1, :]
        b2 = vecs_ref[1:2, :]
        gamma = vecs_ref[2:3, :]
        beta = vecs_ref[3:4, :]
        ngamma = vecs_ref[4:5, :]
        nbeta = vecs_ref[5:6, :]
        # MLP: Linear -> ReLU -> Linear, bf16 x bf16 -> f32 on the MXU.
        h1 = jnp.dot(z.astype(jnp.bfloat16), w1_ref[...],
                     preferred_element_type=jnp.float32) + b1
        h1 = jnp.maximum(h1, 0.0)
        out = jnp.dot(h1.astype(jnp.bfloat16), w2_ref[...],
                      preferred_element_type=jnp.float32) + b2
        # CustomGINConv LayerNorm
        out = _layernorm_padded(out, gamma, beta, c_out_valid)
        # EdgeGNN inter-layer norm (skip connections & not last layer)
        if apply_inter_norm:
            out = _layernorm_padded(out, ngamma, nbeta, c_out_valid)
        if apply_relu:
            out = jnp.maximum(out, 0.0)
        # dropout omitted (eval-mode identity)
        if add_residual:
            out = out + xd_ref[...]          # residual == this layer's input tile
        o_ref[...] = out
        o_bf16_ref[...] = out.astype(jnp.bfloat16)   # next layer's x_src, free VPU cast


def gin_layer(a_bf16, x_bf16, x_f32, eps, w1_bf16, w2_bf16, vecs, *,
              c_out_valid, apply_inter_norm, apply_relu, add_residual, tm, tk):
    np_ = a_bf16.shape[0]
    c_in_pad = x_f32.shape[1]
    c_out_pad = w2_bf16.shape[1]
    assert np_ % tm == 0 and np_ % tk == 0 and tk % tm == 0
    grid = (np_ // tm, np_ // tk)

    # Keep the whole bf16 x_src resident in VMEM when small enough; otherwise
    # stream (tk, C) tiles per contraction step.
    xs_resident = (np_ * c_in_pad * 2) <= XS_RESIDENT_BYTES

    kern = functools.partial(_gin_layer_kernel, c_out_valid, apply_inter_norm,
                             apply_relu, add_residual, xs_resident, tk)

    if xs_resident:
        xs_spec = pl.BlockSpec((np_, c_in_pad), lambda i, k: (0, 0))
    else:
        xs_spec = pl.BlockSpec((tk, c_in_pad), lambda i, k: (k, 0))

    in_specs = [
        pl.BlockSpec(memory_space=pltpu.MemorySpace.SMEM),            # eps (1,1) scalar
        pl.BlockSpec((tm, tk), lambda i, k: (i, k)),                  # A tile (bf16)
        xs_spec,                                                      # x src (bf16)
        pl.BlockSpec((tm, c_in_pad), lambda i, k: (i, 0)),            # x dst / residual (f32)
        pl.BlockSpec((c_in_pad, c_out_pad), lambda i, k: (0, 0)),     # W1 (bf16)
        pl.BlockSpec((c_out_pad, c_out_pad), lambda i, k: (0, 0)),    # W2 (bf16)
        pl.BlockSpec((8, c_out_pad), lambda i, k: (0, 0)),            # packed b1/b2/g/b/ng/nb
    ]
    out_specs = [
        pl.BlockSpec((tm, c_out_pad), lambda i, k: (i, 0)),           # f32 output (residual path)
        pl.BlockSpec((tm, c_out_pad), lambda i, k: (i, 0)),           # bf16 output (next x_src)
    ]
    out_shape = [
        jax.ShapeDtypeStruct((np_, c_out_pad), jnp.float32),
        jax.ShapeDtypeStruct((np_, c_out_pad), jnp.bfloat16),
    ]

    return pl.pallas_call(
        kern,
        out_shape=out_shape,
        grid=grid,
        in_specs=in_specs,
        out_specs=out_specs,
        scratch_shapes=[pltpu.VMEM((tm, c_in_pad), jnp.float32)],
        compiler_params=pltpu.CompilerParams(
            dimension_semantics=("parallel", "arbitrary")),
    )(eps, a_bf16, x_bf16, x_f32, w1_bf16, w2_bf16, vecs)


# ---------------------------------------------------------------------------
# Parameter initialization (deterministic, PyTorch-Linear-like uniform init)
# ---------------------------------------------------------------------------
def _init_linear(key, fan_in, fan_out):
    k1, k2 = jax.random.split(key)
    bound = 1.0 / math.sqrt(fan_in)
    w = jax.random.uniform(k1, (fan_in, fan_out), jnp.float32, -bound, bound)
    b = jax.random.uniform(k2, (1, fan_out), jnp.float32, -bound, bound)
    return w, b


def init_edge_gnn_params(key, in_channels, hidden_channels, num_layers):
    params = []
    c_in = in_channels
    for _ in range(num_layers):
        key, k1, k2 = jax.random.split(key, 3)
        w1, b1 = _init_linear(k1, c_in, hidden_channels)
        w2, b2 = _init_linear(k2, hidden_channels, hidden_channels)
        params.append(dict(
            eps=jnp.zeros((1, 1), jnp.float32),                      # initial_eps = 0.0
            w1=w1, b1=b1, w2=w2, b2=b2,
            gamma=jnp.ones((1, hidden_channels), jnp.float32),       # conv LayerNorm
            beta=jnp.zeros((1, hidden_channels), jnp.float32),
            ngamma=jnp.ones((1, hidden_channels), jnp.float32),      # inter-layer LayerNorm
            nbeta=jnp.zeros((1, hidden_channels), jnp.float32),
        ))
        c_in = hidden_channels
    return params


# ---------------------------------------------------------------------------
# EdgeGNN forward (node embeddings): Pallas path + pure-JAX reference
# ---------------------------------------------------------------------------
def _build_adjacency(edge_index, n, np_):
    # Scatter into the compact (n, n) buffer, cast to bf16 (exact for edge
    # multiplicities <= 256), then zero-pad; avoids a padded-f32 intermediate.
    src, dst = edge_index[0], edge_index[1]
    a_small = (jnp.zeros((n, n), jnp.float32).at[dst, src].add(1.0)
               ).astype(jnp.bfloat16)
    return _pad2(a_small, np_, np_)


def _pack_vecs(p, h_pad):
    rows = [p["b1"], p["b2"], p["gamma"], p["beta"], p["ngamma"], p["nbeta"]]
    v = jnp.zeros((8, h_pad), jnp.float32)
    for r, row in enumerate(rows):
        v = v.at[r, :row.shape[-1]].set(row.reshape(-1))
    return v


def edge_gnn_forward(params, x, edge_index, *, hidden_channels, use_skip=True):
    n, c_in = x.shape
    np_, tm, tk = _pick_tiles(n)
    c_in_pad = _round_up(c_in, 128)
    h_pad = _round_up(hidden_channels, 128)

    a = _build_adjacency(edge_index, n, np_)

    h_f32 = _pad2(x.astype(jnp.float32), np_, c_in_pad)   # input_norm = Identity
    h_bf16 = h_f32.astype(jnp.bfloat16)                    # one-time cast; later layers reuse kernel's bf16 output

    num_layers = len(params)
    cur_valid = c_in
    for i, p in enumerate(params):
        last = (i == num_layers - 1)
        add_res = use_skip and (cur_valid == hidden_channels)
        cur_pad = h_f32.shape[1]
        h_f32, h_bf16 = gin_layer(
            a, h_bf16, h_f32, p["eps"],
            _pad2(p["w1"], cur_pad, h_pad).astype(jnp.bfloat16),
            _pad2(p["w2"], h_pad, h_pad).astype(jnp.bfloat16),
            _pack_vecs(p, h_pad),
            c_out_valid=hidden_channels,
            apply_inter_norm=(use_skip and not last),
            apply_relu=(not last),
            add_residual=add_res,
            tm=tm, tk=tk)
        cur_valid = hidden_channels
    return h_f32[:n, :hidden_channels]


def _layernorm_ref(x, gamma, beta):
    mu = jnp.mean(x, axis=-1, keepdims=True)
    var = jnp.mean((x - mu) ** 2, axis=-1, keepdims=True)
    return (x - mu) * jax.lax.rsqrt(var + LN_EPS) * gamma + beta


def edge_gnn_reference(params, x, edge_index, *, hidden_channels, use_skip=True,
                       bf16_agg=False, bf16_mlp=False):
    n = x.shape[0]
    src, dst = edge_index[0], edge_index[1]
    a = jnp.zeros((n, n), jnp.float32).at[dst, src].add(1.0)

    def bf(v):
        return v.astype(jnp.bfloat16).astype(jnp.float32) if bf16_mlp else v

    num_layers = len(params)
    h = x
    for i, p in enumerate(params):
        last = (i == num_layers - 1)
        h_in = h
        h_agg = h.astype(jnp.bfloat16).astype(jnp.float32) if bf16_agg else h
        agg = a @ h_agg
        z = (1.0 + p["eps"][0, 0]) * h + agg
        h1 = jnp.maximum(bf(z) @ bf(p["w1"]) + p["b1"], 0.0)
        out = bf(h1) @ bf(p["w2"]) + p["b2"]
        out = _layernorm_ref(out, p["gamma"], p["beta"])
        if not last:
            if use_skip:
                out = _layernorm_ref(out, p["ngamma"], p["nbeta"])
            out = jnp.maximum(out, 0.0)
        if use_skip and h_in.shape == out.shape:
            out = out + h_in
        h = out
    return h


if __name__ == "__main__":
    key = jax.random.PRNGKey(0)

    num_nodes = 16
    in_channels = 8
    hidden_channels = 32
    num_layers = 3
    num_edges = 48

    key, kx, ke, kp = jax.random.split(key, 4)
    x = jax.random.normal(kx, (num_nodes, in_channels), jnp.float32)
    edge_index = jax.random.randint(ke, (2, num_edges), 0, num_nodes, jnp.int32)

    params = init_edge_gnn_params(kp, in_channels, hidden_channels, num_layers)

    h_pallas = jax.block_until_ready(
        edge_gnn_forward(params, x, edge_index, hidden_channels=hidden_channels))

    # Precision-matched reference (aggregation + MLP inputs rounded to bf16, like the kernel).
    h_ref_bf16 = jax.block_until_ready(
        edge_gnn_reference(params, x, edge_index, hidden_channels=hidden_channels,
                           bf16_agg=True, bf16_mlp=True))
    # Pure f32 module-semantics reference.
    h_ref_f32 = jax.block_until_ready(
        edge_gnn_reference(params, x, edge_index, hidden_channels=hidden_channels))

    assert h_pallas.shape == (num_nodes, hidden_channels)
    assert jnp.allclose(h_pallas, h_ref_bf16, atol=5e-3, rtol=5e-3)
    rel_err = jnp.linalg.norm(h_pallas - h_ref_f32) / jnp.linalg.norm(h_ref_f32)
    assert float(rel_err) < 5e-2

    print("KERNEL_OK")
</pallas_src>

<mosaic_0001>
module attributes {stable_mosaic.version = 11 : i64} {
  func.func @_gin_layer_kernel(%arg0: i32, %arg1: i32, %arg2: memref<1x1xf32, #tpu.memory_space<smem>>, %arg3: memref<128x128xbf16, #tpu.memory_space<vmem>>, %arg4: memref<128x128xbf16, #tpu.memory_space<vmem>>, %arg5: memref<128x128xf32, #tpu.memory_space<vmem>>, %arg6: memref<128x128xbf16, #tpu.memory_space<vmem>>, %arg7: memref<128x128xbf16, #tpu.memory_space<vmem>>, %arg8: memref<8x128xf32, #tpu.memory_space<vmem>>, %arg9: memref<128x128xf32, #tpu.memory_space<vmem>>, %arg10: memref<128x128xbf16, #tpu.memory_space<vmem>>, %arg11: memref<128x128xf32, #tpu.memory_space<vmem>>) attributes {dimension_semantics = [#tpu.dimension_semantics<parallel>, #tpu.dimension_semantics<arbitrary>], iteration_bounds = array<i64: 1, 1>, scalar_prefetch = 0 : i64, scratch_operands = 1 : i64, tpu.core_type = #tpu.core_type<tc>, window_params = [{transform_indices = @transform_0, window_bounds = array<i64: 1, 1>}, {transform_indices = @transform_1, window_bounds = array<i64: 128, 128>}, {pipeline_mode = #tpu.pipeline_mode<synchronous>, transform_indices = @transform_2, window_bounds = array<i64: 128, 128>}, {transform_indices = @transform_3, window_bounds = array<i64: 128, 128>}, {pipeline_mode = #tpu.pipeline_mode<synchronous>, transform_indices = @transform_4, window_bounds = array<i64: 128, 128>}, {pipeline_mode = #tpu.pipeline_mode<synchronous>, transform_indices = @transform_5, window_bounds = array<i64: 128, 128>}, {pipeline_mode = #tpu.pipeline_mode<synchronous>, transform_indices = @transform_6, window_bounds = array<i64: 8, 128>}, {transform_indices = @transform_7, window_bounds = array<i64: 128, 128>}, {transform_indices = @transform_8, window_bounds = array<i64: 128, 128>}]} {
    %c0_i32 = arith.constant 0 : i32
    %0 = arith.cmpi eq, %arg1, %c0_i32 : i32
    %1 = arith.extui %0 : i1 to i32
    %c0_i32_0 = arith.constant 0 : i32
    %2 = arith.cmpi ne, %1, %c0_i32_0 : i32
    scf.if %2 {
      %c0_9 = arith.constant 0 : index
      %c0_10 = arith.constant 0 : index
      %15 = memref.load %arg2[%c0_9, %c0_10] : memref<1x1xf32, #tpu.memory_space<smem>>
      %cst_11 = arith.constant 1.000000e+00 : f32
      %16 = arith.addf %cst_11, %15 : f32
      %c0_12 = arith.constant 0 : index
      %c0_13 = arith.constant 0 : index
      %17 = vector.load %arg5[%c0_12, %c0_13] : memref<128x128xf32, #tpu.memory_space<vmem>>, vector<128x128xf32>
      %18 = vector.broadcast %16 : f32 to vector<128x128xf32>
      %19 = arith.mulf %18, %17 : vector<128x128xf32>
      %c0_14 = arith.constant 0 : index
      %c0_15 = arith.constant 0 : index
      %20 = vector.load %arg11[%c0_14, %c0_15] : memref<128x128xf32, #tpu.memory_space<vmem>>, vector<128x128xf32>
      tpu.vector_store %arg11[%c0_14, %c0_15], %19 {strides = array<i32>} : memref<128x128xf32, #tpu.memory_space<vmem>>, vector<128x128xf32>,
    } else {
    }
    %c128_i32 = arith.constant 128 : i32
    %3 = arith.muli %arg1, %c128_i32 : i32
    %4 = tpu.assume_multiple %3, 128 : i32
    %5 = arith.index_cast %4 : i32 to index
    %c0 = arith.constant 0 : index
    %6 = vector.load %arg4[%5, %c0] : memref<128x128xbf16, #tpu.memory_space<vmem>>, vector<128x128xbf16>
    %c0_1 = arith.constant 0 : index
    %c0_2 = arith.constant 0 : index
    %7 = vector.load %arg11[%c0_1, %c0_2] : memref<128x128xf32, #tpu.memory_space<vmem>>, vector<128x128xf32>
    %c0_3 = arith.constant 0 : index
    %c0_4 = arith.constant 0 : index
    %8 = vector.load %arg3[%c0_3, %c0_4] : memref<128x128xbf16, #tpu.memory_space<vmem>>, vector<128x128xbf16>
    %cst = arith.constant dense<0.000000e+00> : vector<128x128xf32>
    %9 = tpu.matmul %8, %6, %cst {dimension_numbers = #tpu.dot_dimension_numbers<[1], [0], [0], [1], [0, 0, 1, 1], [], []>} : vector<128x128xbf16>, vector<128x128xbf16>, vector<128x128xf32> -> vector<128x128xf32>
    %10 = arith.addf %7, %9 : vector<128x128xf32>
    %c0_5 = arith.constant 0 : index
    %c0_6 = arith.constant 0 : index
    %11 = vector.load %arg11[%c0_5, %c0_6] : memref<128x128xf32, #tpu.memory_space<vmem>>, vector<128x128xf32>
    tpu.vector_store %arg11[%c0_5, %c0_6], %10 {strides = array<i32>} : memref<128x128xf32, #tpu.memory_space<vmem>>, vector<128x128xf32>,
    %c0_i32_7 = arith.constant 0 : i32
    %12 = arith.cmpi eq, %arg1, %c0_i32_7 : i32
    %13 = arith.extui %12 : i1 to i32
    %c0_i32_8 = arith.constant 0 : i32
    %14 = arith.cmpi ne, %13, %c0_i32_8 : i32
    scf.if %14 {
      %c0_9 = arith.constant 0 : index
      %c0_10 = arith.constant 0 : index
      %15 = vector.load %arg11[%c0_9, %c0_10] : memref<128x128xf32, #tpu.memory_space<vmem>>, vector<128x128xf32>
      %c0_11 = arith.constant 0 : index
      %c0_12 = arith.constant 0 : index
      %16 = vector.load %arg8[%c0_11, %c0_12] : memref<8x128xf32, #tpu.memory_space<vmem>>, vector<1x128xf32>
      %c1 = arith.constant 1 : index
      %c0_13 = arith.constant 0 : index
      %17 = vector.load %arg8[%c1, %c0_13] : memref<8x128xf32, #tpu.memory_space<vmem>>, vector<1x128xf32>
      %c2 = arith.constant 2 : index
      %c0_14 = arith.constant 0 : index
      %18 = vector.load %arg8[%c2, %c0_14] : memref<8x128xf32, #tpu.memory_space<vmem>>, vector<1x128xf32>
      %c3 = arith.constant 3 : index
      %c0_15 = arith.constant 0 : index
      %19 = vector.load %arg8[%c3, %c0_15] : memref<8x128xf32, #tpu.memory_space<vmem>>, vector<1x128xf32>
      %c4 = arith.constant 4 : index
      %c0_16 = arith.constant 0 : index
      %20 = vector.load %arg8[%c4, %c0_16] : memref<8x128xf32, #tpu.memory_space<vmem>>, vector<1x128xf32>
      %c5 = arith.constant 5 : index
      %c0_17 = arith.constant 0 : index
      %21 = vector.load %arg8[%c5, %c0_17] : memref<8x128xf32, #tpu.memory_space<vmem>>, vector<1x128xf32>
      %22 = arith.truncf %15 : vector<128x128xf32> to vector<128x128xbf16>
      %c0_18 = arith.constant 0 : index
      %c0_19 = arith.constant 0 : index
      %23 = vector.load %arg6[%c0_18, %c0_19] : memref<128x128xbf16, #tpu.memory_space<vmem>>, vector<128x128xbf16>
      %cst_20 = arith.constant dense<0.000000e+00> : vector<128x128xf32>
      %24 = tpu.matmul %22, %23, %cst_20 {dimension_numbers = #tpu.dot_dimension_numbers<[1], [0], [0], [1], [0, 0, 1, 1], [], []>} : vector<128x128xbf16>, vector<128x128xbf16>, vector<128x128xf32> -> vector<128x128xf32>
      %25 = vector.broadcast %16 : vector<1x128xf32> to vector<128x128xf32>
      %26 = arith.addf %24, %25 : vector<128x128xf32>
      %cst_21 = arith.constant 0.000000e+00 : f32
      %27 = vector.broadcast %cst_21 : f32 to vector<128x128xf32>
      %28 = arith.maximumf %26, %27 : vector<128x128xf32>
      %29 = arith.truncf %28 : vector<128x128xf32> to vector<128x128xbf16>
      %c0_22 = arith.constant 0 : index
      %c0_23 = arith.constant 0 : index
      %30 = vector.load %arg7[%c0_22, %c0_23] : memref<128x128xbf16, #tpu.memory_space<vmem>>, vector<128x128xbf16>
      %cst_24 = arith.constant dense<0.000000e+00> : vector<128x128xf32>
      %31 = tpu.matmul %29, %30, %cst_24 {dimension_numbers = #tpu.dot_dimension_numbers<[1], [0], [0], [1], [0, 0, 1, 1], [], []>} : vector<128x128xbf16>, vector<128x128xbf16>, vector<128x128xf32> -> vector<128x128xf32>
      %32 = vector.broadcast %17 : vector<1x128xf32> to vector<128x128xf32>
      %33 = arith.addf %31, %32 : vector<128x128xf32>
      %cst_25 = arith.constant dense<0.000000e+00> : vector<128xf32>
      %34 = vector.multi_reduction <add>, %33, %cst_25 [1] : vector<128x128xf32> to vector<128xf32>
      %35 = vector.shape_cast %34 : vector<128xf32> to vector<128x1xf32>
      %cst_26 = arith.constant 3.125000e-02 : f32
      %36 = vector.broadcast %cst_26 : f32 to vector<128x1xf32>
      %37 = arith.mulf %35, %36 : vector<128x1xf32>
      %38 = vector.broadcast %37 : vector<128x1xf32> to vector<128x128xf32>
      %39 = arith.subf %33, %38 : vector<128x128xf32>
      %40 = tpu.iota {dimensions = array<i32: 1>} : vector<128x128xi32>
      %c32_i32 = arith.constant 32 : i32
      %41 = vector.broadcast %c32_i32 : i32 to vector<128x128xi32>
      %42 = arith.cmpi slt, %40, %41 : vector<128x128xi32>
      %cst_27 = arith.constant 0.000000e+00 : f32
      %43 = vector.broadcast %cst_27 : f32 to vector<128x128xf32>
      %44 = arith.select %42, %39, %43 : vector<128x128xi1>, vector<128x128xf32>
      %45 = arith.mulf %44, %44 : vector<128x128xf32>
      %cst_28 = arith.constant dense<0.000000e+00> : vector<128xf32>
      %46 = vector.multi_reduction <add>, %45, %cst_28 [1] : vector<128x128xf32> to vector<128xf32>
      %47 = vector.shape_cast %46 : vector<128xf32> to vector<128x1xf32>
      %cst_29 = arith.constant 3.125000e-02 : f32
      %48 = vector.broadcast %cst_29 : f32 to vector<128x1xf32>
      %49 = arith.mulf %47, %48 : vector<128x1xf32>
      %cst_30 = arith.constant 9.99999974E-6 : f32
      %50 = vector.broadcast %cst_30 : f32 to vector<128x1xf32>
      %51 = arith.addf %49, %50 : vector<128x1xf32>
      %52 = math.rsqrt %51 : vector<128x1xf32>
      %53 = vector.broadcast %52 : vector<128x1xf32> to vector<128x128xf32>
      %54 = arith.mulf %39, %53 : vector<128x128xf32>
      %55 = vector.broadcast %18 : vector<1x128xf32> to vector<128x128xf32>
      %56 = arith.mulf %54, %55 : vector<128x128xf32>
      %57 = vector.broadcast %19 : vector<1x128xf32> to vector<128x128xf32>
      %58 = arith.addf %56, %57 : vector<128x128xf32>
      %cst_31 = arith.constant dense<0.000000e+00> : vector<128xf32>
      %59 = vector.multi_reduction <add>, %58, %cst_31 [1] : vector<128x128xf32> to vector<128xf32>
      %60 = vector.shape_cast %59 : vector<128xf32> to vector<128x1xf32>
      %cst_32 = arith.constant 3.125000e-02 : f32
      %61 = vector.broadcast %cst_32 : f32 to vector<128x1xf32>
      %62 = arith.mulf %60, %61 : vector<128x1xf32>
      %63 = vector.broadcast %62 : vector<128x1xf32> to vector<128x128xf32>
      %64 = arith.subf %58, %63 : vector<128x128xf32>
      %65 = tpu.iota {dimensions = array<i32: 1>} : vector<128x128xi32>
      %c32_i32_33 = arith.constant 32 : i32
      %66 = vector.broadcast %c32_i32_33 : i32 to vector<128x128xi32>
      %67 = arith.cmpi slt, %65, %66 : vector<128x128xi32>
      %cst_34 = arith.constant 0.000000e+00 : f32
      %68 = vector.broadcast %cst_34 : f32 to vector<128x128xf32>
      %69 = arith.select %67, %64, %68 : vector<128x128xi1>, vector<128x128xf32>
      %70 = arith.mulf %69, %69 : vector<128x128xf32>
      %cst_35 = arith.constant dense<0.000000e+00> : vector<128xf32>
      %71 = vector.multi_reduction <add>, %70, %cst_35 [1] : vector<128x128xf32> to vector<128xf32>
      %72 = vector.shape_cast %71 : vector<128xf32> to vector<128x1xf32>
      %cst_36 = arith.constant 3.125000e-02 : f32
      %73 = vector.broadcast %cst_36 : f32 to vector<128x1xf32>
      %74 = arith.mulf %72, %73 : vector<128x1xf32>
      %cst_37 = arith.constant 9.99999974E-6 : f32
      %75 = vector.broadcast %cst_37 : f32 to vector<128x1xf32>
      %76 = arith.addf %74, %75 : vector<128x1xf32>
      %77 = math.rsqrt %76 : vector<128x1xf32>
      %78 = vector.broadcast %77 : vector<128x1xf32> to vector<128x128xf32>
      %79 = arith.mulf %64, %78 : vector<128x128xf32>
      %80 = vector.broadcast %20 : vector<1x128xf32> to vector<128x128xf32>
      %81 = arith.mulf %79, %80 : vector<128x128xf32>
      %82 = vector.broadcast %21 : vector<1x128xf32> to vector<128x128xf32>
      %83 = arith.addf %81, %82 : vector<128x128xf32>
      %cst_38 = arith.constant 0.000000e+00 : f32
      %84 = vector.broadcast %cst_38 : f32 to vector<128x128xf32>
      %85 = arith.maximumf %83, %84 : vector<128x128xf32>
      %c0_39 = arith.constant 0 : index
      %c0_40 = arith.constant 0 : index
      %86 = vector.load %arg9[%c0_39, %c0_40] : memref<128x128xf32, #tpu.memory_space<vmem>>, vector<128x128xf32>
      tpu.vector_store %arg9[%c0_39, %c0_40], %85 {strides = array<i32>} : memref<128x128xf32, #tpu.memory_space<vmem>>, vector<128x128xf32>,
      %87 = arith.truncf %85 : vector<128x128xf32> to vector<128x128xbf16>
      %c0_41 = arith.constant 0 : index
      %c0_42 = arith.constant 0 : index
      %88 = vector.load %arg10[%c0_41, %c0_42] : memref<128x128xbf16, #tpu.memory_space<vmem>>, vector<128x128xbf16>
      tpu.vector_store %arg10[%c0_41, %c0_42], %87 {strides = array<i32>} : memref<128x128xbf16, #tpu.memory_space<vmem>>, vector<128x128xbf16>,
    } else {
    }
    return
  }
  func.func @transform_0(%arg0: i32, %arg1: i32) -> (i32, i32) {
    %c0_i32 = arith.constant 0 : i32
    %c0_i32_0 = arith.constant 0 : i32
    %c0_i32_1 = arith.constant 0 : i32
    return %c0_i32, %c0_i32_0 : i32, i32
  }
  func.func @transform_1(%arg0: i32, %arg1: i32) -> (i32, i32) {
    %c0_i32 = arith.constant 0 : i32
    return %arg0, %arg1 : i32, i32
  }
  func.func @transform_2(%arg0: i32, %arg1: i32) -> (i32, i32) {
    %c0_i32 = arith.constant 0 : i32
    %c0_i32_0 = arith.constant 0 : i32
    %c0_i32_1 = arith.constant 0 : i32
    return %c0_i32, %c0_i32_0 : i32, i32
  }
  func.func @transform_3(%arg0: i32, %arg1: i32) -> (i32, i32) {
    %c0_i32 = arith.constant 0 : i32
    %c0_i32_0 = arith.constant 0 : i32
    return %arg0, %c0_i32 : i32, i32
  }
  func.func @transform_4(%arg0: i32, %arg1: i32) -> (i32, i32) {
    %c0_i32 = arith.constant 0 : i32
    %c0_i32_0 = arith.constant 0 : i32
    %c0_i32_1 = arith.constant 0 : i32
    return %c0_i32, %c0_i32_0 : i32, i32
  }
  func.func @transform_5(%arg0: i32, %arg1: i32) -> (i32, i32) {
    %c0_i32 = arith.constant 0 : i32
    %c0_i32_0 = arith.constant 0 : i32
    %c0_i32_1 = arith.constant 0 : i32
    return %c0_i32, %c0_i32_0 : i32, i32
  }
  func.func @transform_6(%arg0: i32, %arg1: i32) -> (i32, i32) {
    %c0_i32 = arith.constant 0 : i32
    %c0_i32_0 = arith.constant 0 : i32
    %c0_i32_1 = arith.constant 0 : i32
    return %c0_i32, %c0_i32_0 : i32, i32
  }
  func.func @transform_7(%arg0: i32, %arg1: i32) -> (i32, i32) {
    %c0_i32 = arith.constant 0 : i32
    %c0_i32_0 = arith.constant 0 : i32
    return %arg0, %c0_i32 : i32, i32
  }
  func.func @transform_8(%arg0: i32, %arg1: i32) -> (i32, i32) {
    %c0_i32 = arith.constant 0 : i32
    %c0_i32_0 = arith.constant 0 : i32
    return %arg0, %c0_i32 : i32, i32
  }
}

</mosaic_0001>

<bundles_post_ra>
// kernel: tpu_custom_call.1
= control target key start
LH: loop header
LB: loop body
LE: loop exit
PB: predicated region body
PF: predicated region fallthrough
CT: control target
= control target key end

     0   :  { %15 = vsyncpa [#allocation5], 0  ;;  %s2606_s0 = inlined_call_operand.<no memory space> [shape: f32[1,1], index: 0, kind: input, shape index: {}]   ;;  %s2607_s1 = inlined_call_operand.hbm [shape: bf16[128,128], index: 1, kind: input, shape index: {}]   ;;  %s2608_s2 = inlined_call_operand.hbm [shape: bf16[128,128], index: 2, kind: input, shape index: {}]   ;;  %s2609_s3 = inlined_call_operand.hbm [shape: f32[128,128], index: 3, kind: input, shape index: {}]   ;;  %s2610_s4 = inlined_call_operand.hbm [shape: bf16[128,128], index: 4, kind: input, shape index: {}]   ;;  %s2611_s5 = inlined_call_operand.hbm [shape: bf16[128,128], index: 5, kind: input, shape index: {}]   ;;  %s2612_s6 = inlined_call_operand.vmem [shape: f32[8,128], index: 6, kind: input, shape index: {}]   ;;  %s2613_s7 = inlined_call_operand.hbm [shape: f32[128,128], index: 7, kind: output, shape index: {0}]   ;;  %s2614_s8 = inlined_call_operand.hbm [shape: bf16[128,128], index: 8, kind: output, shape index: {1}]  }
   0x1   :  { %16 = vsyncpa [#allocation8], 0 }
   0x2   :  { %17 = vsyncpa [#allocation11], 0 }
   0x3   :  { %18 = vsyncpa [#allocation6], 0 }
   0x4   :  { %19 = vsyncpa [#allocation15], 0  ;;  %s1984_s27 = smov [#allocation7]   ;;  %s1985_s29 = smov [#allocation10]  }
   0x5   :  { %s39_s28 = sshll.u32 %s1984_s27, 4  ;;  %s63_s30 = sshll.u32 %s1985_s29, 4  ;;  %s40_s28 = int_to_ptr.vmem [resolvable:$true] %s39_s28  ;;  %s2040_s30 = int_to_ptr.vmem [resolvable:$true] %s63_s30 }
   0x6   :  { %s1820_s11 = scalar_lea.hbm %s2608_s2, 1024 }
   0x7   :  { %p1821_p0 = scmp.ne.s32.totalorder %s2608_s2, %s1820_s11  ;;  %p1824_p1 = scmp.lt.u32.totalorder %s1820_s11, %s2608_s2 }
   0x9   :  { %p1826_p2 = pnand %p1824_p1, %p1821_p0 }
   0xb   :  { %1829 = shalt.err (!%p1826_p2)
}
   0xc   :  { %s1830_s16 = scalar_lea.vmem %s40_s28, 1024  ;;  %p1835_p4 = scmp.lt.s32.totalorder %s40_s28, %s40_s28 }
   0xd   :  { %p1831_p3 = scmp.ne.s32.totalorder %s40_s28, %s1830_s16  ;;  %p1836_p5 = scmp.lt.s32.totalorder %s1830_s16, %s1830_s16 }
   0xf   :  { %p1837_p6 = por %p1836_p5, %p1835_p4 }
  0x11   :  { %p1838_p7 = pnand %p1837_p6, %p1831_p3 }
  0x13   :  { %1841 = shalt.err (!%p1838_p7)
}
  0x14   :  { %s1986_s17 = smov 64   ;;  %s1987_s18 = smov 4  }
  0x15   :  { %45 = dma.hbm_to_vmem [thread:$0]  %s2608_s2, 1024, %s40_s28, [#allocation8], %s1986_s17, %s1986_s17, %s1987_s18  }
  0x16   :  { %s1842_s23 = scalar_lea.hbm %s2610_s4, 1024 }
  0x17   :  { %p1843_p8 = scmp.ne.s32.totalorder %s2610_s4, %s1842_s23  ;;  %p1846_p9 = scmp.lt.u32.totalorder %s1842_s23, %s2610_s4 }
  0x19   :  { %p1848_p10 = pnand %p1846_p9, %p1843_p8 }
  0x1b   :  { %1851 = shalt.err (!%p1848_p10)
}
  0x1c   :  { %s1852_s29 = scalar_lea.vmem %s2040_s30, 1024  ;;  %p1857_p12 = scmp.lt.s32.totalorder %s2040_s30, %s2040_s30 }
  0x1d   :  { %p1853_p11 = scmp.ne.s32.totalorder %s2040_s30, %s1852_s29  ;;  %p1858_p13 = scmp.lt.s32.totalorder %s1852_s29, %s1852_s29 }
  0x1f   :  { %p1859_p0 = por %p1858_p13, %p1857_p12 }
  0x21   :  { %p1860_p1 = pnand %p1859_p0, %p1853_p11 }
  0x23   :  { %1863 = shalt.err (!%p1860_p1)
}
  0x24   :  { %69 = dma.hbm_to_vmem [thread:$0]  %s2610_s4, 1024, %s2040_s30, [#allocation11], %s1986_s17, %s1986_s17, %s1987_s18  }
  0x25   :  { %s1988_s9 = smov [#allocation4]   ;;  %s1989_s11 = smov [#allocation9]  }
  0x26   :  { %s27_s10 = sshll.u32 %s1988_s9, 4  ;;  %s51_s12 = sshll.u32 %s1989_s11, 4  ;;  %s28_s10 = int_to_ptr.vmem [resolvable:$true] %s27_s10  ;;  %s2077_s12 = int_to_ptr.vmem [resolvable:$true] %s51_s12 }
  0x27   :  { %s1864_s15 = scalar_lea.hbm %s2607_s1, 1024 }
  0x28   :  { %p1865_p2 = scmp.ne.s32.totalorder %s2607_s1, %s1864_s15  ;;  %p1868_p3 = scmp.lt.u32.totalorder %s1864_s15, %s2607_s1 }
  0x2a   :  { %p1870_p4 = pnand %p1868_p3, %p1865_p2 }
  0x2c   :  { %1873 = shalt.err (!%p1870_p4)
}
  0x2d   :  { %s1874_s4 = scalar_lea.vmem %s28_s10, 1024  ;;  %p1879_p6 = scmp.lt.s32.totalorder %s28_s10, %s28_s10 }
  0x2e   :  { %p1875_p5 = scmp.ne.s32.totalorder %s28_s10, %s1874_s4  ;;  %p1880_p7 = scmp.lt.s32.totalorder %s1874_s4, %s1874_s4 }
  0x30   :  { %p1881_p8 = por %p1880_p7, %p1879_p6 }
  0x32   :  { %p1882_p9 = pnand %p1881_p8, %p1875_p5 }
  0x34   :  { %1885 = shalt.err (!%p1882_p9)
}
  0x35   :  { %33 = dma.hbm_to_vmem [thread:$0]  %s2607_s1, 1024, %s28_s10, [#allocation5], %s1986_s17, %s1986_s17, %s1987_s18  }
  0x36   :  { %s1886_s25 = scalar_lea.hbm %s2609_s3, 2048 }
  0x37   :  { %p1887_p10 = scmp.ne.s32.totalorder %s2609_s3, %s1886_s25  ;;  %p1890_p11 = scmp.lt.u32.totalorder %s1886_s25, %s2609_s3 }
  0x39   :  { %p1892_p12 = pnand %p1890_p11, %p1887_p10 }
  0x3b   :  { %1895 = shalt.err (!%p1892_p12)
}
  0x3c   :  { %s1896_s28 = scalar_lea.vmem %s2077_s12, 2048  ;;  %p1901_p0 = scmp.lt.s32.totalorder %s2077_s12, %s2077_s12 }
  0x3d   :  { %p1897_p13 = scmp.ne.s32.totalorder %s2077_s12, %s1896_s28  ;;  %p1902_p1 = scmp.lt.s32.totalorder %s1896_s28, %s1896_s28 }
  0x3f   :  { %p1903_p2 = por %p1902_p1, %p1901_p0 }
  0x41   :  { %p1904_p3 = pnand %p1903_p2, %p1897_p13 }
  0x43   :  { %1907 = shalt.err (!%p1904_p3)
}
  0x44   :  { %s1990_s1 = smov 128   ;;  %s1991_s9 = smov 8  }
  0x45   :  { %57 = dma.hbm_to_vmem [thread:$0]  %s2609_s3, 2048, %s2077_s12, [#allocation8], %s1990_s1, %s1990_s1, %s1991_s9  }
  0x46   :  { %s1992_s13 = smov [#allocation12]   ;;  %s1908_s19 = scalar_lea.hbm %s2611_s5, 1024 }
  0x47   :  { %s75_s14 = sshll.u32 %s1992_s13, 4  ;;  %p1909_p4 = scmp.ne.s32.totalorder %s2611_s5, %s1908_s19  ;;  %s76_s14 = int_to_ptr.vmem [resolvable:$true] %s75_s14 }
  0x48   :  { %p1912_p5 = scmp.lt.u32.totalorder %s1908_s19, %s2611_s5 }
  0x4a   :  { %p1914_p6 = pnand %p1912_p5, %p1909_p4 }
  0x4c   :  { %1917 = shalt.err (!%p1914_p6)
}
  0x4d   :  { %s1918_s22 = scalar_lea.vmem %s76_s14, 1024  ;;  %p1923_p8 = scmp.lt.s32.totalorder %s76_s14, %s76_s14 }
  0x4e   :  { %p1919_p7 = scmp.ne.s32.totalorder %s76_s14, %s1918_s22  ;;  %p1924_p9 = scmp.lt.s32.totalorder %s1918_s22, %s1918_s22 }
  0x50   :  { %p1925_p10 = por %p1924_p9, %p1923_p8 }
  0x52   :  { %p1926_p11 = pnand %p1925_p10, %p1919_p7 }
  0x54   :  { %1929 = shalt.err (!%p1926_p11)
}
  0x55   :  { %81 = dma.hbm_to_vmem [thread:$0]  %s2611_s5, 1024, %s76_s14, [#allocation11], %s1986_s17, %s1986_s17, %s1987_s18  }
  0x56   :  { %1974 = dma.done.wait [#allocation5], 1024  }
  0x57   :  { %1975 = vsyncadd [#allocation5], 4294966272 }
  0x58   :  { %1976 = dma.done.wait [#allocation8], 3072  }
  0x59   :  { %1977 = vsyncadd [#allocation8], 4294964224 }
  0x5a   :  { %1978 = dma.done.wait [#allocation11], 2048  }
  0x5b   :  { %1979 = vsyncadd [#allocation11], 4294965248  ;;  %v1724_v0 = vld [vmem:[#allocation7] sm:$0xff]   ;;  %v1725_v1 = vld [vmem:[#allocation7 + $0x8] sm:$0xff]   ;;  %s105_s24 = sadd.f32 1.0, %s2606_s0  ;;  %s1994_s19 = smov [#allocation14]  }
  0x5c   :  { %1601 = vmatprep.subr.bf16.mxu0 %v1724_v0  ;;  %v1726_v2 = vld [vmem:[#allocation7 + $0x10] sm:$0xff]   ;;  %v1727_v3 = vld [vmem:[#allocation7 + $0x18] sm:$0xff]   ;;  %v1732_v4 = vld [vmem:[#allocation4] sm:$0xff]   ;;  %s1416_s20 = sshll.u32 %s1994_s19, 4  ;;  %s2569_s20 = int_to_ptr.vmem [resolvable:$true] %s1416_s20 }
  0x5d   :  { %1602 = vmatpush3.bf16.msra.mxu0 %v1724_v0  ;;  %1617 = vmatprep.mubr.bf16.mxu0 %v1732_v4  ;;  %v1728_v5 = vld [vmem:[#allocation7 + $0x20] sm:$0xff]   ;;  %v1729_v6 = vld [vmem:[#allocation7 + $0x28] sm:$0xff]   ;;  %v1730_v9 = vld [vmem:[#allocation7 + $0x30] sm:$0xff]   ;;  %v2152_v31 = vstv %s105_s24 }
  0x5e   :  { %1603 = vmatprep.subr.bf16.mxu0 %v1725_v1  ;;  %v1740_v7 = vld [vmem:[#allocation10] sm:$0xff]   ;;  %v1741_v8 = vld [vmem:[#allocation10 + $0x8] sm:$0xff]   ;;  %v1742_v10 = vld [vmem:[#allocation10 + $0x10] sm:$0xff]  }
  0x5f   :  { %1633 = vmatprep.subr.bf16.mxu1 %v1740_v7  ;;  %v1731_v11 = vld [vmem:[#allocation7 + $0x38] sm:$0xff]   ;;  %v1744_v13 = vld [vmem:[#allocation10 + $0x20] sm:$0xff]   ;;  %v1733_v14 = vld [vmem:[#allocation4 + $0x8] sm:$0xff]  }
  0x60   :  { %1634 = vmatpush3.bf16.msra.mxu1 %v1740_v7  ;;  %v1743_v12 = vld [vmem:[#allocation10 + $0x18] sm:$0xff]   ;;  %v1734_v15 = vld [vmem:[#allocation4 + $0x10] sm:$0xff]   ;;  %v1745_v16 = vld [vmem:[#allocation10 + $0x28] sm:$0xff]  }
  0x61   :  { %1604 = vmatpush3.bf16.msra.mxu0 %v1725_v1  ;;  %1635 = vmatprep.subr.bf16.mxu1 %v1741_v8  ;;  %v1735_v17 = vld [vmem:[#allocation4 + $0x18] sm:$0xff]   ;;  %v1736_v18 = vld [vmem:[#allocation4 + $0x20] sm:$0xff]   ;;  %v1737_v19 = vld [vmem:[#allocation4 + $0x28] sm:$0xff]  }
  0x62   :  { %1605 = vmatprep.subr.bf16.mxu0 %v1726_v2  ;;  %v1738_v20 = vld [vmem:[#allocation4 + $0x30] sm:$0xff]   ;;  %v1739_v21 = vld [vmem:[#allocation4 + $0x38] sm:$0xff]   ;;  %v1748_v24 = vld [vmem:[#allocation12] sm:$0xff]  }
  0x63   :  { %v1746_v22 = vld [vmem:[#allocation10 + $0x30] sm:$0xff]   ;;  %v1747_v23 = vld [vmem:[#allocation10 + $0x38] sm:$0xff]   ;;  %v2129_v25 = vld [vmem:[#allocation12 + $0x8] sm:$0xff]  }
  0x64   :  { %1636 = vmatpush3.bf16.msra.mxu1 %v1741_v8  ;;  %v2132_v26 = vld [vmem:[#allocation12 + $0x10] sm:$0xff]   ;;  %v2136_v27 = vld [vmem:[#allocation12 + $0x18] sm:$0xff]   ;;  %v2140_v28 = vld [vmem:[#allocation12 + $0x20] sm:$0xff]  }
  0x65   :  { %1606 = vmatpush3.bf16.msra.mxu0 %v1726_v2  ;;  %1637 = vmatprep.subr.bf16.mxu1 %v1742_v10  ;;  %v2144_v29 = vld [vmem:[#allocation12 + $0x28] sm:$0xff]   ;;  %v108_v30 = vld [vmem:[#allocation9 + $0x10] sm:$0xff]  ;;  %v109_v32 = vld [vmem:[#allocation9 + $0x18] sm:$0xff] }
  0x66   :  { %1607 = vmatprep.subr.bf16.mxu0 %v1727_v3  ;;  %v106_v33 = vld [vmem:[#allocation9] sm:$0xff]  ;;  %v107_v34 = vld [vmem:[#allocation9 + $0x8] sm:$0xff]  ;;  %v125_v35 = vmul.f32 %v2152_v31, %v108_v30  ;;  %v126_v36 = vmul.f32 %v2152_v31, %v109_v32  ;;  %v112_v42 = vld [vmem:[#allocation9 + $0x30] sm:$0xff] }
  0x67   :  { %v123_v38 = vmul.f32 %v2152_v31, %v106_v33  ;;  %v124_v39 = vmul.f32 %v2152_v31, %v107_v34  ;;  %v113_v48 = vld [vmem:[#allocation9 + $0x38] sm:$0xff]  ;;  %v129_v50 = vmul.f32 %v2152_v31, %v112_v42  ;;  %v110_v51 = vld [vmem:[#allocation9 + $0x20] sm:$0xff]  ;;  %v111_v52 = vld [vmem:[#allocation9 + $0x28] sm:$0xff] }
  0x68   :  { %1638 = vmatpush3.bf16.msra.mxu1 %v1742_v10  ;;  %v130_v54 = vmul.f32 %v2152_v31, %v113_v48  ;;  %v127_v56 = vmul.f32 %v2152_v31, %v110_v51  ;;  %v128_v57 = vmul.f32 %v2152_v31, %v111_v52  ;;  %v116_v61 = vld [vmem:[#allocation9 + $0x50] sm:$0xff]  ;;  %v117_v2 = vld [vmem:[#allocation9 + $0x58] sm:$0xff] }
  0x69   :  { %1608 = vmatpush3.bf16.msra.mxu0 %v1727_v3  ;;  %1639 = vmatprep.subr.bf16.mxu1 %v1743_v12  ;;  %v133_v4 = vmul.f32 %v2152_v31, %v116_v61  ;;  %v134_v8 = vmul.f32 %v2152_v31, %v117_v2  ;;  %v1754_v42 = vld [vmem:[#allocation12 + $0x30] sm:$0xff]  }
  0x6a   :  { %1609 = vmatprep.subr.bf16.mxu0 %v1728_v5 }
  0x6c   :  { %1640 = vmatpush3.bf16.msra.mxu1 %v1743_v12 }
  0x6d   :  { %1610 = vmatpush3.bf16.msra.mxu0 %v1728_v5  ;;  %1641 = vmatprep.subr.bf16.mxu1 %v1744_v13  ;;  %v114_v5 = vld [vmem:[#allocation9 + $0x40] sm:$0xff] }
  0x6e   :  { %1611 = vmatprep.subr.bf16.mxu0 %v1729_v6  ;;  %v131_v10 = vmul.f32 %v2152_v31, %v114_v5 }
  0x70   :  { %1642 = vmatpush3.bf16.msra.mxu1 %v1744_v13 }
  0x71   :  { %1612 = vmatpush3.bf16.msra.mxu0 %v1729_v6  ;;  %1643 = vmatprep.subr.bf16.mxu1 %v1745_v16  ;;  %v115_v6 = vld [vmem:[#allocation9 + $0x48] sm:$0xff] }
  0x72   :  { %1613 = vmatprep.subr.bf16.mxu0 %v1730_v9 }
  0x74   :  { %1644 = vmatpush3.bf16.msra.mxu1 %v1745_v16 }
  0x75   :  { %1614 = vmatpush3.bf16.msra.mxu0 %v1730_v9  ;;  %1645 = vmatprep.subr.bf16.mxu1 %v1746_v22 }
  0x76   :  { %1615 = vmatprep.subr.bf16.mxu0 %v1731_v11 }
  0x78   :  { %1646 = vmatpush3.bf16.msra.mxu1 %v1746_v22 }
  0x79   :  { %1616 = vmatpush3.bf16.msra.mxu0 %v1731_v11  ;;  %1647 = vmatprep.subr.bf16.mxu1 %v1747_v23  ;;  %v132_v11 = vmul.f32 %v2152_v31, %v115_v6 }
  0x7a   :  { %1665 = vmatprep.subr.bf16.mxu0 %v1748_v24 }
  0x7c   :  { %1618 = vmatmul.mubr.bf16.vlgmr.msra.gmra.mrb[0].mxu0 %v1733_v14  ;;  %1648 = vmatpush3.bf16.msra.mxu1 %v1747_v23  ;;  %v118_v23 = vld [vmem:[#allocation9 + $0x60] sm:$0xff] }
  0x7d   :  { %1621 = vmatprep.mubr.bf16.mxu0 %v1734_v15  ;;  %1697 = vmatprep.subr.bf16.mxu1 %v1748_v24  ;;  %v120_v15 = vld [vmem:[#allocation9 + $0x70] sm:$0xff]  ;;  %v135_v32 = vmul.f32 %v2152_v31, %v118_v23 }
  0x7e   :  { %1666 = vmatpush3.bf16.msra.mxu0 %v1748_v24  ;;  %v137_v22 = vmul.f32 %v2152_v31, %v120_v15 }
  0x7f   :  { %1667 = vmatprep.subr.bf16.mxu0 %v2129_v25 }
  0x82   :  { %1668 = vmatpush3.bf16.msra.mxu0 %v2129_v25 }
  0x83   :  { %1669 = vmatprep.subr.bf16.mxu0 %v2132_v26 }
  0x84   :  { %1622 = vmatmul.mubr.bf16.gmra.mrb[4].mxu0 %v1735_v17 }
  0x85   :  { %1625 = vmatprep.mubr.bf16.mxu0 %v1736_v18 }
  0x86   :  { %1670 = vmatpush3.bf16.msra.mxu0 %v2132_v26 }
  0x87   :  { %1671 = vmatprep.subr.bf16.mxu0 %v2136_v27 }
  0x8a   :  { %1672 = vmatpush3.bf16.msra.mxu0 %v2136_v27 }
  0x8b   :  { %1673 = vmatprep.subr.bf16.mxu0 %v2140_v28 }
  0x8c   :  { %1626 = vmatmul.mubr.bf16.gmra.mrb[8].mxu0 %v1737_v19 }
  0x8d   :  { %1629 = vmatprep.mubr.bf16.mxu0 %v1738_v20  ;;  %v121_v20 = vld [vmem:[#allocation9 + $0x78] sm:$0xff] }
  0x8e   :  { %1674 = vmatpush3.bf16.msra.mxu0 %v2140_v28  ;;  %v138_v30 = vmul.f32 %v2152_v31, %v121_v20 }
  0x8f   :  { %1675 = vmatprep.subr.bf16.mxu0 %v2144_v29 }
  0x92   :  { %1676 = vmatpush3.bf16.msra.mxu0 %v2144_v29 }
  0x93   :  { %1677 = vmatprep.subr.bf16.mxu0 %v1754_v42 }
  0x94   :  { %1630 = vmatmul.mubr.bf16.gmra.mrb[12].mxu0 %v1739_v21 }
  0x96   :  { %1678 = vmatpush3.bf16.msra.mxu0 %v1754_v42 }
 0x14f   :  { %v1619_v37 = vpop.f32.mrb[0].mxu0 }
 0x150   :  { %v338_v40 = vpop.f32.mrb[1].mxu0  ;;  %v403_v43 = vadd.f32 %v1619_v37, %v125_v35 }
 0x151   :  { %v1620_v41 = vpop.f32.mrb[2].mxu0  ;;  %v401_v46 = vadd.f32 %v338_v40, %v123_v38 }
 0x152   :  { %v404_v44 = vadd.f32 %v1620_v41, %v126_v36  ;;  %v341_v45 = vpop.f32.mrb[3].mxu0 }
 0x153   :  { %v402_v47 = vadd.f32 %v341_v45, %v124_v39 }
 0x154   :  { %v459_v49 = vpack.c.bf16 %v404_v44, %v403_v43 }
 0x155   :  { %v458_v53 = vpack.c.bf16 %v402_v47, %v401_v46 }
 0x157   :  { %v1623_v55 = vpop.f32.mrb[4].mxu0  ;;  %1649 = vmatprep.mubr.bf16.mxu1 %v458_v53 }
 0x158   :  { %v407_v58 = vadd.f32 %v1623_v55, %v129_v50  ;;  %v354_v59 = vpop.f32.mrb[5].mxu0  ;;  %1650 = vmatmul.mubr.bf16.vlgmr.msra.gmra.mrb[0].mxu1 %v459_v49 }
 0x159   :  { %v1624_v60 = vpop.f32.mrb[6].mxu0  ;;  %1705 = vmatpush3.bf16.msra.mxu1 %v1748_v24  ;;  %v405_v0 = vadd.f32 %v354_v59, %v127_v56  ;;  %v119_v24 = vld [vmem:[#allocation9 + $0x68] sm:$0xff] }
 0x15a   :  { %v408_v62 = vadd.f32 %v1624_v60, %v130_v54  ;;  %v357_v63 = vpop.f32.mrb[7].mxu0  ;;  %1698 = vmatprep.subr.bf16.mxu1 %v2129_v25  ;;  %v136_v33 = vmul.f32 %v2152_v31, %v119_v24  ;;  %v1755_v31 = vld [vmem:[#allocation12 + $0x38] sm:$0xff]  }
 0x15b   :  { %v406_v1 = vadd.f32 %v357_v63, %v128_v57  ;;  %1679 = vmatprep.subr.bf16.mxu0 %v1755_v31 }
 0x15c   :  { %v461_v3 = vpack.c.bf16 %v408_v62, %v407_v58  ;;  %1680 = vmatpush3.bf16.msra.mxu0 %v1755_v31 }
 0x15d   :  { %v460_v7 = vpack.c.bf16 %v406_v1, %v405_v0  ;;  %1706 = vmatpush3.bf16.msra.mxu1 %v2129_v25 }
 0x15e   :  { %1699 = vmatprep.subr.bf16.mxu1 %v2132_v26 }
 0x15f   :  { %v1627_v9 = vpop.f32.mrb[8].mxu0  ;;  %1653 = vmatprep.mubr.bf16.mxu1 %v460_v7 }
 0x160   :  { %v411_v12 = vadd.f32 %v1627_v9, %v133_v4  ;;  %v370_v13 = vpop.f32.mrb[9].mxu0  ;;  %1654 = vmatmul.mubr.bf16.gmra.mrb[4].mxu1 %v461_v3 }
 0x161   :  { %v1628_v14 = vpop.f32.mrb[10].mxu0  ;;  %1707 = vmatpush3.bf16.msra.mxu1 %v2132_v26  ;;  %v409_v18 = vadd.f32 %v370_v13, %v131_v10 }
 0x162   :  { %v412_v16 = vadd.f32 %v1628_v14, %v134_v8  ;;  %v373_v17 = vpop.f32.mrb[11].mxu0  ;;  %1700 = vmatprep.subr.bf16.mxu1 %v2136_v27 }
 0x163   :  { %v410_v19 = vadd.f32 %v373_v17, %v132_v11 }
 0x164   :  { %v463_v21 = vpack.c.bf16 %v412_v16, %v411_v12 }
 0x165   :  { %v462_v25 = vpack.c.bf16 %v410_v19, %v409_v18  ;;  %1708 = vmatpush3.bf16.msra.mxu1 %v2136_v27 }
 0x166   :  { %1701 = vmatprep.subr.bf16.mxu1 %v2140_v28 }
 0x167   :  { %v1631_v26 = vpop.f32.mrb[12].mxu0  ;;  %1657 = vmatprep.mubr.bf16.mxu1 %v462_v25 }
 0x168   :  { %v415_v34 = vadd.f32 %v1631_v26, %v137_v22  ;;  %v386_v35 = vpop.f32.mrb[13].mxu0  ;;  %1658 = vmatmul.mubr.bf16.gmra.mrb[8].mxu1 %v463_v21 }
 0x169   :  { %v1632_v36 = vpop.f32.mrb[14].mxu0  ;;  %1709 = vmatpush3.bf16.msra.mxu1 %v2140_v28  ;;  %v413_v27 = vadd.f32 %v386_v35, %v135_v32  ;;  %v1452_v28 = vld [vmem:[%s2612_s6] ss:$0 sm:$0xff] }
 0x16a   :  { %v416_v37 = vadd.f32 %v1632_v36, %v138_v30  ;;  %v389_v38 = vpop.f32.mrb[15].mxu0  ;;  %1702 = vmatprep.subr.bf16.mxu1 %v2144_v29 }
 0x16b   :  { %v414_v39 = vadd.f32 %v389_v38, %v136_v33  ;;  %v1461_v38 = vld [vmem:[%s2612_s6 + $0x1] ss:$0 sm:$0xff] }
 0x16c   :  { %v465_v40 = vpack.c.bf16 %v416_v37, %v415_v34 }
 0x16d   :  { %v464_v41 = vpack.c.bf16 %v414_v39, %v413_v27  ;;  %1710 = vmatpush3.bf16.msra.mxu1 %v2144_v29 }
 0x16e   :  { %1703 = vmatprep.subr.bf16.mxu1 %v1754_v42 }
 0x16f   :  { %1661 = vmatprep.mubr.bf16.mxu1 %v464_v41 }
 0x170   :  { %1662 = vmatmul.mubr.bf16.gmra.mrb[12].mxu1 %v465_v40 }
 0x171   :  { %1711 = vmatpush3.bf16.msra.mxu1 %v1754_v42 }
 0x172   :  { %1704 = vmatprep.subr.bf16.mxu1 %v1755_v31 }
 0x175   :  { %1712 = vmatpush3.bf16.msra.mxu1 %v1755_v31 }
 0x22b   :  { %v1651_v43 = vpop.f32.mrb[0].mxu1 }
 0x22c   :  { %v577_v44 = vadd.f32 %v1651_v43, %v1452_v28  ;;  %v568_v45 = vpop.f32.mrb[1].mxu1 }
 0x22d   :  { %v569_v29 = vadd.f32 %v1452_v28, %v568_v45  ;;  %v1652_v46 = vpop.f32.mrb[2].mxu1 }
 0x22e   :  { %v580_v47 = vadd.f32 %v1652_v46, %v1452_v28  ;;  %v571_v48 = vpop.f32.mrb[3].mxu1  ;;  %v633_v50 = vmax.f32 %v577_v44, 0.0 }
 0x22f   :  { %v572_v49 = vadd.f32 %v1452_v28, %v571_v48  ;;  %v631_v52 = vmax.f32 %v569_v29, 0.0 }
 0x230   :  { %v634_v51 = vmax.f32 %v580_v47, 0.0 }
 0x231   :  { %v632_v53 = vmax.f32 %v572_v49, 0.0 }
 0x232   :  { %v648_v54 = vpack.c.bf16 %v634_v51, %v633_v50 }
 0x233   :  { %v647_v55 = vpack.c.bf16 %v632_v53, %v631_v52  ;;  %v1655_v56 = vpop.f32.mrb[4].mxu1 }
 0x234   :  { %v593_v57 = vadd.f32 %v1655_v56, %v1452_v28  ;;  %v584_v58 = vpop.f32.mrb[5].mxu1 }
 0x235   :  { %v585_v59 = vadd.f32 %v1452_v28, %v584_v58  ;;  %v1656_v60 = vpop.f32.mrb[6].mxu1  ;;  %1681 = vmatprep.mubr.bf16.mxu0 %v647_v55 }
 0x236   :  { %v596_v61 = vadd.f32 %v1656_v60, %v1452_v28  ;;  %v587_v62 = vpop.f32.mrb[7].mxu1  ;;  %1682 = vmatmul.mubr.bf16.vlgmr.msra.gmra.mrb[16].mxu0 %v648_v54  ;;  %v637_v0 = vmax.f32 %v593_v57, 0.0 }
 0x237   :  { %v588_v63 = vadd.f32 %v1452_v28, %v587_v62  ;;  %v635_v2 = vmax.f32 %v585_v59, 0.0 }
 0x238   :  { %v638_v1 = vmax.f32 %v596_v61, 0.0 }
 0x239   :  { %v636_v3 = vmax.f32 %v588_v63, 0.0 }
 0x23a   :  { %v650_v4 = vpack.c.bf16 %v638_v1, %v637_v0 }
 0x23b   :  { %v649_v5 = vpack.c.bf16 %v636_v3, %v635_v2  ;;  %v1659_v6 = vpop.f32.mrb[8].mxu1  ;;  %v884_v3 = vlaneseq }
 0x23c   :  { %v609_v7 = vadd.f32 %v1659_v6, %v1452_v28  ;;  %v600_v8 = vpop.f32.mrb[9].mxu1 }
 0x23d   :  { %v601_v9 = vadd.f32 %v1452_v28, %v600_v8  ;;  %v1660_v10 = vpop.f32.mrb[10].mxu1  ;;  %1685 = vmatprep.mubr.bf16.mxu0 %v649_v5 }
 0x23e   :  { %v612_v11 = vadd.f32 %v1660_v10, %v1452_v28  ;;  %v603_v12 = vpop.f32.mrb[11].mxu1  ;;  %1686 = vmatmul.mubr.bf16.gmra.mrb[20].mxu0 %v650_v4  ;;  %v641_v14 = vmax.f32 %v609_v7, 0.0  ;;  %v2216_v4 = vand.u32 127, %v884_v3 }
 0x23f   :  { %v604_v13 = vadd.f32 %v1452_v28, %v603_v12  ;;  %v639_v16 = vmax.f32 %v601_v9, 0.0 }
 0x240   :  { %v642_v15 = vmax.f32 %v612_v11, 0.0  ;;  %vm886_vm0 = vcmp.lt.s32.totalorder %v2216_v4, 32 }
 0x241   :  { %v640_v17 = vmax.f32 %v604_v13, 0.0 }
 0x242   :  { %v652_v18 = vpack.c.bf16 %v642_v15, %v641_v14 }
 0x243   :  { %v651_v19 = vpack.c.bf16 %v640_v17, %v639_v16  ;;  %v1663_v20 = vpop.f32.mrb[12].mxu1 }
 0x244   :  { %v625_v21 = vadd.f32 %v1663_v20, %v1452_v28  ;;  %v616_v22 = vpop.f32.mrb[13].mxu1 }
 0x245   :  { %v617_v23 = vadd.f32 %v1452_v28, %v616_v22  ;;  %v1664_v24 = vpop.f32.mrb[14].mxu1  ;;  %1689 = vmatprep.mubr.bf16.mxu1 %v651_v19 }
 0x246   :  { %v628_v25 = vadd.f32 %v1664_v24, %v1452_v28  ;;  %v619_v30 = vpop.f32.mrb[15].mxu1  ;;  %1690 = vmatmul.mubr.bf16.vlgmr.msra.gmra.mrb[16].mxu1 %v652_v18  ;;  %v645_v32 = vmax.f32 %v625_v21, 0.0 }
 0x247   :  { %v620_v26 = vadd.f32 %v1452_v28, %v619_v30  ;;  %v643_v34 = vmax.f32 %v617_v23, 0.0 }
 0x248   :  { %v646_v33 = vmax.f32 %v628_v25, 0.0 }
 0x249   :  { %v644_v35 = vmax.f32 %v620_v26, 0.0 }
 0x24a   :  { %v654_v36 = vpack.c.bf16 %v646_v33, %v645_v32 }
 0x24b   :  { %v653_v37 = vpack.c.bf16 %v644_v35, %v643_v34 }
 0x24d   :  { %1693 = vmatprep.mubr.bf16.mxu1 %v653_v37 }
 0x24e   :  { %1694 = vmatmul.mubr.bf16.gmra.mrb[20].mxu1 %v654_v36 }
 0x309   :  { %v1683_v27 = vpop.f32.mrb[16].mxu0 }
 0x30a   :  { %v766_v39 = vadd.f32 %v1683_v27, %v1461_v38  ;;  %v757_v40 = vpop.f32.mrb[17].mxu0 }
 0x30b   :  { %v758_v41 = vadd.f32 %v1461_v38, %v757_v40  ;;  %v1684_v42 = vpop.f32.mrb[18].mxu0 }
 0x30c   :  { %824 = vadd.xlane.f32.xlu1 %v766_v39  ;;  %v760_v31 = vpop.f32.mrb[19].mxu0  ;;  %v769_v28 = vadd.f32 %v1684_v42, %v1461_v38 }
 0x30d   :  { %820 = vadd.xlane.f32.xlu0 %v758_v41  ;;  %v761_v43 = vadd.f32 %v1461_v38, %v760_v31 }
 0x310   :  { %826 = vadd.xlane.f32.xlu1 %v769_v28 }
 0x311   :  { %v1687_v44 = vpop.f32.mrb[20].mxu0  ;;  %822 = vadd.xlane.f32.xlu0 %v761_v43 }
 0x312   :  { %v782_v45 = vadd.f32 %v1687_v44, %v1461_v38  ;;  %v773_v29 = vpop.f32.mrb[21].mxu0 }
 0x313   :  { %v1688_v46 = vpop.f32.mrb[22].mxu0  ;;  %v2186_v49 = vadd.f32 %v1461_v38, %v773_v29 }
 0x314   :  { %v785_v47 = vadd.f32 %v1688_v46, %v1461_v38  ;;  %v776_v48 = vpop.f32.mrb[23].mxu0 }
 0x315   :  { %832 = vadd.xlane.f32.xlu0 %v782_v45  ;;  %v2188_v50 = vadd.f32 %v1461_v38, %v776_v48 }
 0x316   :  { %834 = vadd.xlane.f32.xlu1 %v785_v47 }
 0x319   :  { %v1691_v51 = vpop.f32.mrb[16].mxu1  ;;  %828 = vadd.xlane.f32.xlu0 %v2186_v49 }
 0x31a   :  { %v2191_v52 = vadd.f32 %v1691_v51, %v1461_v38  ;;  %v789_v53 = vpop.f32.mrb[17].mxu1  ;;  %830 = vadd.xlane.f32.xlu1 %v2188_v50 }
 0x31b   :  { %v1692_v54 = vpop.f32.mrb[18].mxu1  ;;  %v2198_v57 = vadd.f32 %v1461_v38, %v789_v53 }
 0x31c   :  { %v2194_v55 = vadd.f32 %v1692_v54, %v1461_v38  ;;  %v792_v56 = vpop.f32.mrb[19].mxu1 }
 0x31d   :  { %840 = vadd.xlane.f32.xlu0 %v2191_v52  ;;  %v2200_v58 = vadd.f32 %v1461_v38, %v792_v56 }
 0x31e   :  { %842 = vadd.xlane.f32.xlu1 %v2194_v55 }
 0x321   :  { %v1695_v59 = vpop.f32.mrb[20].mxu1  ;;  %836 = vadd.xlane.f32.xlu0 %v2198_v57 }
 0x322   :  { %v805_v60 = vpop.f32.mrb[21].mxu1  ;;  %838 = vadd.xlane.f32.xlu1 %v2200_v58  ;;  %v2209_v1 = vadd.f32 %v1695_v59, %v1461_v38 }
 0x323   :  { %v2204_v61 = vadd.f32 %v1461_v38, %v805_v60  ;;  %v1696_v62 = vpop.f32.mrb[22].mxu1 }
 0x324   :  { %v808_v63 = vpop.f32.mrb[23].mxu1  ;;  %v2212_v2 = vadd.f32 %v1696_v62, %v1461_v38 }
 0x325   :  { %v2206_v0 = vadd.f32 %v1461_v38, %v808_v63  ;;  %844 = vadd.xlane.f32.xlu0 %v2204_v61 }
 0x327   :  { %846 = vadd.xlane.f32.xlu1 %v2206_v0 }
 0x329   :  { %848 = vadd.xlane.f32.xlu0 %v2209_v1 }
 0x32b   :  { %850 = vadd.xlane.f32.xlu1 %v2212_v2 }
 0x399   :  { %v825_v5 = vpop.xlane.xlu1 %824 }
 0x39a   :  { %v854_v6 = vmul.f32 0.03125, %v825_v5  ;;  %v821_v7 = vpop.xlane.xlu0 %820 }
 0x39b   :  { %v852_v8 = vmul.f32 0.03125, %v821_v7 }
 0x39c   :  { %v2219_v9 = vsub.f32 %v766_v39, %v854_v6 }
 0x39d   :  { %v2221_v10 = vsub.f32 %v758_v41, %v852_v8  ;;  %v827_v11 = vpop.xlane.xlu1 %826 }
 0x39e   :  { %v855_v12 = vmul.f32 0.03125, %v827_v11  ;;  %v823_v13 = vpop.xlane.xlu0 %822  ;;  %v889_v14 = vsel %vm886_vm0, %v2219_v9, 0.0 }
 0x39f   :  { %v853_v15 = vmul.f32 0.03125, %v823_v13  ;;  %v905_v16 = vmul.f32 %v889_v14, %v889_v14  ;;  %v887_v18 = vsel %vm886_vm0, %v2221_v10, 0.0 }
 0x3a0   :  { %v2226_v17 = vsub.f32 %v769_v28, %v855_v12  ;;  %v903_v25 = vmul.f32 %v887_v18, %v887_v18 }
 0x3a1   :  { %v2231_v19 = vsub.f32 %v761_v43, %v853_v15  ;;  %923 = vadd.xlane.f32.xlu0 %v905_v16 }
 0x3a2   :  { %v833_v20 = vpop.xlane.xlu0 %832  ;;  %v890_v21 = vsel %vm886_vm0, %v2226_v17, 0.0 }
 0x3a3   :  { %v858_v22 = vmul.f32 0.03125, %v833_v20  ;;  %v835_v23 = vpop.xlane.xlu1 %834  ;;  %v906_v24 = vmul.f32 %v890_v21, %v890_v21  ;;  %v888_v26 = vsel %vm886_vm0, %v2231_v19, 0.0 }
 0x3a4   :  { %v859_v30 = vmul.f32 0.03125, %v835_v23  ;;  %v904_v37 = vmul.f32 %v888_v26, %v888_v26 }
 0x3a5   :  { %v2239_v32 = vsub.f32 %v782_v45, %v858_v22  ;;  %925 = vadd.xlane.f32.xlu1 %v906_v24  ;;  %919 = vadd.xlane.f32.xlu0 %v903_v25 }
 0x3a6   :  { %v2241_v33 = vsub.f32 %v785_v47, %v859_v30  ;;  %v829_v34 = vpop.xlane.xlu0 %828 }
 0x3a7   :  { %v856_v35 = vmul.f32 0.03125, %v829_v34  ;;  %v831_v36 = vpop.xlane.xlu1 %830  ;;  %v893_v38 = vsel %vm886_vm0, %v2239_v32, 0.0 }
 0x3a8   :  { %v857_v27 = vmul.f32 0.03125, %v831_v36  ;;  %v909_v39 = vmul.f32 %v893_v38, %v893_v38  ;;  %v894_v40 = vsel %vm886_vm0, %v2241_v33, 0.0 }
 0x3a9   :  { %v2250_v41 = vsub.f32 %v2186_v49, %v856_v35  ;;  %921 = vadd.xlane.f32.xlu1 %v904_v37  ;;  %v910_v44 = vmul.f32 %v894_v40, %v894_v40 }
 0x3aa   :  { %v2253_v42 = vsub.f32 %v2188_v50, %v857_v27  ;;  %931 = vadd.xlane.f32.xlu0 %v909_v39  ;;  %v841_v31 = vpop.xlane.xlu0 %840 }
 0x3ab   :  { %v862_v28 = vmul.f32 0.03125, %v841_v31  ;;  %v843_v43 = vpop.xlane.xlu1 %842  ;;  %v891_v45 = vsel %vm886_vm0, %v2250_v41, 0.0 }
 0x3ac   :  { %v863_v29 = vmul.f32 0.03125, %v843_v43  ;;  %v907_v46 = vmul.f32 %v891_v45, %v891_v45  ;;  %v892_v47 = vsel %vm886_vm0, %v2253_v42, 0.0 }
 0x3ad   :  { %v2262_v48 = vsub.f32 %v2191_v52, %v862_v28  ;;  %933 = vadd.xlane.f32.xlu1 %v910_v44  ;;  %v908_v54 = vmul.f32 %v892_v47, %v892_v47 }
 0x3ae   :  { %v2265_v49 = vsub.f32 %v2194_v55, %v863_v29  ;;  %927 = vadd.xlane.f32.xlu0 %v907_v46  ;;  %v837_v50 = vpop.xlane.xlu0 %836 }
 0x3af   :  { %v860_v51 = vmul.f32 0.03125, %v837_v50  ;;  %v839_v53 = vpop.xlane.xlu1 %838  ;;  %v897_v56 = vsel %vm886_vm0, %v2262_v48, 0.0 }
 0x3b0   :  { %v861_v59 = vmul.f32 0.03125, %v839_v53  ;;  %v913_v60 = vmul.f32 %v897_v56, %v897_v56  ;;  %v898_v52 = vsel %vm886_vm0, %v2265_v49, 0.0 }
 0x3b1   :  { %v2274_v62 = vsub.f32 %v2198_v57, %v860_v51  ;;  %929 = vadd.xlane.f32.xlu1 %v908_v54  ;;  %v914_v5 = vmul.f32 %v898_v52, %v898_v52  ;;  %v2312_v54 = vld [vmem:[%s2612_s6 + $0x2] ss:$0 sm:$0xff] }
 0x3b2   :  { %v2277_v55 = vsub.f32 %v2200_v58, %v861_v59  ;;  %939 = vadd.xlane.f32.xlu0 %v913_v60  ;;  %v845_v63 = vpop.xlane.xlu0 %844 }
 0x3b3   :  { %v864_v3 = vmul.f32 0.03125, %v845_v63  ;;  %v895_v6 = vsel %vm886_vm0, %v2274_v62, 0.0 }
 0x3b4   :  { %v847_v7 = vpop.xlane.xlu1 %846  ;;  %v911_v8 = vmul.f32 %v895_v6, %v895_v6  ;;  %v896_v11 = vsel %vm886_vm0, %v2277_v55, 0.0 }
 0x3b5   :  { %v2286_v57 = vsub.f32 %v2204_v61, %v864_v3  ;;  %v865_v12 = vmul.f32 0.03125, %v847_v7  ;;  %941 = vadd.xlane.f32.xlu1 %v914_v5  ;;  %v912_v15 = vmul.f32 %v896_v11, %v896_v11  ;;  %v2318_v3 = vld [vmem:[%s2612_s6 + $0x3] ss:$0 sm:$0xff] }
 0x3b6   :  { %935 = vadd.xlane.f32.xlu0 %v911_v8  ;;  %v849_v58 = vpop.xlane.xlu0 %848 }
 0x3b7   :  { %v2289_v13 = vsub.f32 %v2206_v0, %v865_v12  ;;  %v866_v14 = vmul.f32 0.03125, %v849_v58  ;;  %v899_v16 = vsel %vm886_vm0, %v2286_v57, 0.0 }
 0x3b8   :  { %v851_v18 = vpop.xlane.xlu1 %850  ;;  %v915_v20 = vmul.f32 %v899_v16, %v899_v16 }
 0x3b9   :  { %v2295_v21 = vsub.f32 %v2209_v1, %v866_v14  ;;  %v867_v61 = vmul.f32 0.03125, %v851_v18  ;;  %937 = vadd.xlane.f32.xlu1 %v912_v15  ;;  %v900_v22 = vsel %vm886_vm0, %v2289_v13, 0.0 }
 0x3ba   :  { %943 = vadd.xlane.f32.xlu0 %v915_v20  ;;  %v916_v0 = vmul.f32 %v900_v22, %v900_v22 }
 0x3bb   :  { %v2301_v23 = vsub.f32 %v2212_v2, %v867_v61  ;;  %v901_v24 = vsel %vm886_vm0, %v2295_v21, 0.0 }
 0x3bc   :  { %v917_v25 = vmul.f32 %v901_v24, %v901_v24 }
 0x3bd   :  { %945 = vadd.xlane.f32.xlu1 %v916_v0  ;;  %v902_v1 = vsel %vm886_vm0, %v2301_v23, 0.0 }
 0x3be   :  { %947 = vadd.xlane.f32.xlu0 %v917_v25  ;;  %v918_v30 = vmul.f32 %v902_v1, %v902_v1 }
 0x3c1   :  { %949 = vadd.xlane.f32.xlu1 %v918_v30 }
 0x42e   :  { %v924_v26 = vpop.xlane.xlu0 %923 }
 0x42f   :  { %v953_v34 = vmul.f32 0.03125, %v924_v26 }
 0x431   :  { %v969_v35 = vadd.f32 1e-05, %v953_v34 }
 0x432   :  { %v926_v36 = vpop.xlane.xlu1 %925  ;;  %v920_v37 = vpop.xlane.xlu0 %919 }
 0x433   :  { %1756 = vrsqrt.f32 %v969_v35  ;;  %v954_v2 = vmul.f32 0.03125, %v926_v36  ;;  %v951_v38 = vmul.f32 0.03125, %v920_v37 }
 0x435   :  { %v970_v27 = vadd.f32 1e-05, %v954_v2  ;;  %v967_v39 = vadd.f32 1e-05, %v951_v38 }
 0x436   :  { %v922_v40 = vpop.xlane.xlu1 %921 }
 0x437   :  { %1758 = vrsqrt.f32 %v970_v27  ;;  %v952_v31 = vmul.f32 0.03125, %v922_v40  ;;  %v932_v28 = vpop.xlane.xlu0 %931 }
 0x438   :  { %1760 = vrsqrt.f32 %v967_v39  ;;  %v957_v43 = vmul.f32 0.03125, %v932_v28 }
 0x439   :  { %v968_v44 = vadd.f32 1e-05, %v952_v31 }
 0x43a   :  { %v973_v45 = vadd.f32 1e-05, %v957_v43  ;;  %v934_v29 = vpop.xlane.xlu1 %933 }
 0x43b   :  { %1762 = vrsqrt.f32 %v968_v44  ;;  %v958_v46 = vmul.f32 0.03125, %v934_v29  ;;  %v928_v47 = vpop.xlane.xlu0 %927 }
 0x43c   :  { %1764 = vrsqrt.f32 %v973_v45  ;;  %v955_v50 = vmul.f32 0.03125, %v928_v47 }
 0x43d   :  { %v1757_v51 = vpop.eup %1756  ;;  %v974_v53 = vadd.f32 1e-05, %v958_v46 }
 0x43e   :  { %v971_v56 = vadd.f32 1e-05, %v955_v50  ;;  %v930_v59 = vpop.xlane.xlu1 %929  ;;  %v1001_v60 = vmul.f32 %v1757_v51, %v2219_v9 }
 0x43f   :  { %1766 = vrsqrt.f32 %v974_v53  ;;  %v956_v52 = vmul.f32 0.03125, %v930_v59  ;;  %v940_v63 = vpop.xlane.xlu0 %939 }
 0x440   :  { %1768 = vrsqrt.f32 %v971_v56  ;;  %v961_v5 = vmul.f32 0.03125, %v940_v63  ;;  %v1021_v6 = vmul.f32 %v2312_v54, %v1001_v60 }
 0x441   :  { %v1759_v7 = vpop.eup %1758  ;;  %v972_v8 = vadd.f32 1e-05, %v956_v52 }
 0x442   :  { %v1761_v11 = vpop.eup %1760  ;;  %v977_v12 = vadd.f32 1e-05, %v961_v5  ;;  %v942_v58 = vpop.xlane.xlu1 %941  ;;  %v2322_v14 = vadd.f32 %v2318_v3, %v1021_v6  ;;  %v1002_v9 = vmul.f32 %v1759_v7, %v2226_v17 }
 0x443   :  { %1770 = vrsqrt.f32 %v972_v8  ;;  %v962_v15 = vmul.f32 0.03125, %v942_v58  ;;  %v936_v16 = vpop.xlane.xlu0 %935  ;;  %v999_v18 = vmul.f32 %v1761_v11, %v2221_v10 }
 0x444   :  { %1772 = vrsqrt.f32 %v977_v12  ;;  %v959_v20 = vmul.f32 0.03125, %v936_v16  ;;  %1059 = vadd.xlane.f32.xlu0 %v2322_v14  ;;  %v1022_v61 = vmul.f32 %v2312_v54, %v1002_v9 }
 0x445   :  { %v1763_v22 = vpop.eup %1762  ;;  %v978_v0 = vadd.f32 1e-05, %v962_v15  ;;  %v1019_v24 = vmul.f32 %v2312_v54, %v999_v18 }
 0x446   :  { %v1765_v25 = vpop.eup %1764  ;;  %v975_v1 = vadd.f32 1e-05, %v959_v20  ;;  %v938_v30 = vpop.xlane.xlu1 %937  ;;  %v2330_v17 = vadd.f32 %v2318_v3, %v1022_v61  ;;  %v1000_v26 = vmul.f32 %v1763_v22, %v2231_v19 }
 0x447   :  { %1774 = vrsqrt.f32 %v978_v0  ;;  %v960_v10 = vmul.f32 0.03125, %v938_v30  ;;  %v944_v34 = vpop.xlane.xlu0 %943  ;;  %v2334_v35 = vadd.f32 %v2318_v3, %v1019_v24  ;;  %v1005_v36 = vmul.f32 %v1765_v25, %v2239_v32 }
 0x448   :  { %1776 = vrsqrt.f32 %v975_v1  ;;  %v963_v37 = vmul.f32 0.03125, %v944_v34  ;;  %1061 = vadd.xlane.f32.xlu1 %v2330_v17  ;;  %v1020_v2 = vmul.f32 %v2312_v54, %v1000_v26 }
 0x449   :  { %v1767_v38 = vpop.eup %1766  ;;  %v976_v27 = vadd.f32 1e-05, %v960_v10  ;;  %1055 = vadd.xlane.f32.xlu0 %v2334_v35  ;;  %v1025_v19 = vmul.f32 %v2312_v54, %v1005_v36 }
 0x44a   :  { %v1769_v39 = vpop.eup %1768  ;;  %v979_v40 = vadd.f32 1e-05, %v963_v37  ;;  %v946_v31 = vpop.xlane.xlu1 %945  ;;  %v2342_v28 = vadd.f32 %v2318_v3, %v1020_v2  ;;  %v1006_v32 = vmul.f32 %v1767_v38, %v2241_v33 }
 0x44b   :  { %1778 = vrsqrt.f32 %v976_v27  ;;  %v964_v43 = vmul.f32 0.03125, %v946_v31  ;;  %v948_v44 = vpop.xlane.xlu0 %947  ;;  %v2346_v45 = vadd.f32 %v2318_v3, %v1025_v19  ;;  %v1003_v29 = vmul.f32 %v1769_v39, %v2250_v41 }
 0x44c   :  { %1780 = vrsqrt.f32 %v979_v40  ;;  %v965_v46 = vmul.f32 0.03125, %v948_v44  ;;  %1057 = vadd.xlane.f32.xlu1 %v2342_v28  ;;  %v1026_v47 = vmul.f32 %v2312_v54, %v1006_v32 }
 0x44d   :  { %v1771_v50 = vpop.eup %1770  ;;  %v980_v51 = vadd.f32 1e-05, %v964_v43  ;;  %1067 = vadd.xlane.f32.xlu0 %v2346_v45  ;;  %v1023_v33 = vmul.f32 %v2312_v54, %v1003_v29 }
 0x44e   :  { %v1773_v53 = vpop.eup %1772  ;;  %v981_v56 = vadd.f32 1e-05, %v965_v46  ;;  %v950_v59 = vpop.xlane.xlu1 %949  ;;  %v2354_v60 = vadd.f32 %v2318_v3, %v1026_v47  ;;  %v1004_v41 = vmul.f32 %v1771_v50, %v2253_v42 }
 0x44f   :  { %1782 = vrsqrt.f32 %v980_v51  ;;  %v966_v52 = vmul.f32 0.03125, %v950_v59  ;;  %v2358_v63 = vadd.f32 %v2318_v3, %v1023_v33  ;;  %v1009_v5 = vmul.f32 %v1773_v53, %v2262_v48 }
 0x450   :  { %1784 = vrsqrt.f32 %v981_v56  ;;  %1069 = vadd.xlane.f32.xlu1 %v2354_v60  ;;  %v1024_v6 = vmul.f32 %v2312_v54, %v1004_v41 }
 0x451   :  { %v1775_v7 = vpop.eup %1774  ;;  %v982_v8 = vadd.f32 1e-05, %v966_v52  ;;  %1063 = vadd.xlane.f32.xlu0 %v2358_v63  ;;  %v1029_v11 = vmul.f32 %v2312_v54, %v1009_v5 }
 0x452   :  { %v1777_v12 = vpop.eup %1776  ;;  %v2366_v42 = vadd.f32 %v2318_v3, %v1024_v6  ;;  %v1010_v58 = vmul.f32 %v1775_v7, %v2265_v49 }
 0x453   :  { %1786 = vrsqrt.f32 %v982_v8  ;;  %v2370_v48 = vadd.f32 %v2318_v3, %v1029_v11  ;;  %v1007_v9 = vmul.f32 %v1777_v12, %v2274_v62 }
 0x454   :  { %1065 = vadd.xlane.f32.xlu1 %v2366_v42  ;;  %v1030_v15 = vmul.f32 %v2312_v54, %v1010_v58 }
 0x455   :  { %v1779_v16 = vpop.eup %1778  ;;  %1075 = vadd.xlane.f32.xlu0 %v2370_v48  ;;  %v1027_v18 = vmul.f32 %v2312_v54, %v1007_v9 }
 0x456   :  { %v1781_v20 = vpop.eup %1780  ;;  %v2378_v61 = vadd.f32 %v2318_v3, %v1030_v15  ;;  %v1008_v49 = vmul.f32 %v1779_v16, %v2277_v55 }
 0x457   :  { %v2382_v22 = vadd.f32 %v2318_v3, %v1027_v18  ;;  %v1011_v62 = vmul.f32 %v1781_v20, %v2286_v57 }
 0x458   :  { %1077 = vadd.xlane.f32.xlu1 %v2378_v61  ;;  %v1028_v0 = vmul.f32 %v2312_v54, %v1008_v49 }
 0x459   :  { %v1783_v24 = vpop.eup %1782  ;;  %1071 = vadd.xlane.f32.xlu0 %v2382_v22  ;;  %v1031_v25 = vmul.f32 %v2312_v54, %v1011_v62 }
 0x45a   :  { %v1785_v1 = vpop.eup %1784  ;;  %v2390_v30 = vadd.f32 %v2318_v3, %v1028_v0  ;;  %v1012_v55 = vmul.f32 %v1783_v24, %v2289_v13 }
 0x45b   :  { %v2394_v26 = vadd.f32 %v2318_v3, %v1031_v25  ;;  %v1013_v57 = vmul.f32 %v1785_v1, %v2295_v21 }
 0x45c   :  { %1073 = vadd.xlane.f32.xlu1 %v2390_v30  ;;  %v1032_v10 = vmul.f32 %v2312_v54, %v1012_v55 }
 0x45d   :  { %v1787_v34 = vpop.eup %1786  ;;  %1079 = vadd.xlane.f32.xlu0 %v2394_v26  ;;  %v1033_v36 = vmul.f32 %v2312_v54, %v1013_v57 }
 0x45e   :  { %v2402_v37 = vadd.f32 %v2318_v3, %v1032_v10  ;;  %v1014_v2 = vmul.f32 %v1787_v34, %v2301_v23 }
 0x45f   :  { %v2406_v13 = vadd.f32 %v2318_v3, %v1033_v36 }
 0x460   :  { %1081 = vadd.xlane.f32.xlu1 %v2402_v37  ;;  %v1034_v21 = vmul.f32 %v2312_v54, %v1014_v2 }
 0x461   :  { %1083 = vadd.xlane.f32.xlu0 %v2406_v13 }
 0x462   :  { %v2412_v38 = vadd.f32 %v2318_v3, %v1034_v21 }
 0x464   :  { %1085 = vadd.xlane.f32.xlu1 %v2412_v38 }
 0x4d1   :  { %v1060_v27 = vpop.xlane.xlu0 %1059 }
 0x4d2   :  { %v1089_v19 = vmul.f32 0.03125, %v1060_v27 }
 0x4d4   :  { %v2416_v39 = vsub.f32 %v2322_v14, %v1089_v19 }
 0x4d5   :  { %v1062_v23 = vpop.xlane.xlu1 %1061 }
 0x4d6   :  { %v1090_v40 = vmul.f32 0.03125, %v1062_v23  ;;  %v1056_v31 = vpop.xlane.xlu0 %1055  ;;  %v1121_v32 = vsel %vm886_vm0, %v2416_v39, 0.0 }
 0x4d7   :  { %v1087_v54 = vmul.f32 0.03125, %v1056_v31  ;;  %v1137_v43 = vmul.f32 %v1121_v32, %v1121_v32 }
 0x4d8   :  { %v2422_v44 = vsub.f32 %v2330_v17, %v1090_v40 }
 0x4d9   :  { %v2425_v3 = vsub.f32 %v2334_v35, %v1087_v54  ;;  %v1058_v29 = vpop.xlane.xlu1 %1057  ;;  %1155 = vadd.xlane.f32.xlu0 %v1137_v43 }
 0x4da   :  { %v1088_v46 = vmul.f32 0.03125, %v1058_v29  ;;  %v1068_v14 = vpop.xlane.xlu0 %1067  ;;  %v1122_v47 = vsel %vm886_vm0, %v2422_v44, 0.0 }
 0x4db   :  { %v1093_v50 = vmul.f32 0.03125, %v1068_v14  ;;  %v1138_v51 = vmul.f32 %v1122_v47, %v1122_v47  ;;  %v1119_v33 = vsel %vm886_vm0, %v2425_v3, 0.0 }
 0x4dc   :  { %v2434_v17 = vsub.f32 %v2342_v28, %v1088_v46  ;;  %v1135_v53 = vmul.f32 %v1119_v33, %v1119_v33 }
 0x4dd   :  { %v2437_v35 = vsub.f32 %v2346_v45, %v1093_v50  ;;  %1157 = vadd.xlane.f32.xlu1 %v1138_v51  ;;  %v1070_v56 = vpop.xlane.xlu1 %1069 }
 0x4de   :  { %v1094_v59 = vmul.f32 0.03125, %v1070_v56  ;;  %1151 = vadd.xlane.f32.xlu0 %v1135_v53  ;;  %v1064_v41 = vpop.xlane.xlu0 %1063  ;;  %v1120_v52 = vsel %vm886_vm0, %v2434_v17, 0.0 }
 0x4df   :  { %v1091_v5 = vmul.f32 0.03125, %v1064_v41  ;;  %v1136_v6 = vmul.f32 %v1120_v52, %v1120_v52  ;;  %v1125_v28 = vsel %vm886_vm0, %v2437_v35, 0.0 }
 0x4e0   :  { %v2446_v7 = vsub.f32 %v2354_v60, %v1094_v59  ;;  %v1141_v45 = vmul.f32 %v1125_v28, %v1125_v28 }
 0x4e1   :  { %v2449_v8 = vsub.f32 %v2358_v63, %v1091_v5  ;;  %1153 = vadd.xlane.f32.xlu1 %v1136_v6  ;;  %v1066_v11 = vpop.xlane.xlu1 %1065 }
 0x4e2   :  { %v1092_v12 = vmul.f32 0.03125, %v1066_v11  ;;  %1163 = vadd.xlane.f32.xlu0 %v1141_v45  ;;  %v1076_v58 = vpop.xlane.xlu0 %1075  ;;  %v1126_v9 = vsel %vm886_vm0, %v2446_v7, 0.0 }
 0x4e3   :  { %v1097_v15 = vmul.f32 0.03125, %v1076_v58  ;;  %v1142_v16 = vmul.f32 %v1126_v9, %v1126_v9  ;;  %v1123_v60 = vsel %vm886_vm0, %v2449_v8, 0.0 }
 0x4e4   :  { %v2458_v18 = vsub.f32 %v2366_v42, %v1092_v12  ;;  %v1139_v63 = vmul.f32 %v1123_v60, %v1123_v60 }
 0x4e5   :  { %v2461_v20 = vsub.f32 %v2370_v48, %v1097_v15  ;;  %1165 = vadd.xlane.f32.xlu1 %v1142_v16  ;;  %v1078_v49 = vpop.xlane.xlu1 %1077 }
 0x4e6   :  { %v1098_v62 = vmul.f32 0.03125, %v1078_v49  ;;  %1159 = vadd.xlane.f32.xlu0 %v1139_v63  ;;  %v1072_v0 = vpop.xlane.xlu0 %1071  ;;  %v1124_v24 = vsel %vm886_vm0, %v2458_v18, 0.0 }
 0x4e7   :  { %v1095_v25 = vmul.f32 0.03125, %v1072_v0  ;;  %v1140_v1 = vmul.f32 %v1124_v24, %v1124_v24  ;;  %v1129_v42 = vsel %vm886_vm0, %v2461_v20, 0.0 }
 0x4e8   :  { %v2470_v55 = vsub.f32 %v2378_v61, %v1098_v62  ;;  %v1145_v48 = vmul.f32 %v1129_v42, %v1129_v42 }
 0x4e9   :  { %v2473_v57 = vsub.f32 %v2382_v22, %v1095_v25  ;;  %1161 = vadd.xlane.f32.xlu1 %v1140_v1  ;;  %v1074_v10 = vpop.xlane.xlu1 %1073  ;;  %v2514_v25 = vld [vmem:[%s2612_s6 + $0x4] ss:$0 sm:$0xff] }
 0x4ea   :  { %v1096_v34 = vmul.f32 0.03125, %v1074_v10  ;;  %1171 = vadd.xlane.f32.xlu0 %v1145_v48  ;;  %v1080_v36 = vpop.xlane.xlu0 %1079  ;;  %v1130_v2 = vsel %vm886_vm0, %v2470_v55, 0.0 }
 0x4eb   :  { %v1099_v21 = vmul.f32 0.03125, %v1080_v36  ;;  %v1146_v27 = vmul.f32 %v1130_v2, %v1130_v2  ;;  %v1127_v61 = vsel %vm886_vm0, %v2473_v57, 0.0 }
 0x4ec   :  { %v2482_v19 = vsub.f32 %v2390_v30, %v1096_v34  ;;  %v1143_v22 = vmul.f32 %v1127_v61, %v1127_v61  ;;  %v2520_v34 = vld [vmem:[%s2612_s6 + $0x5] ss:$0 sm:$0xff]  ;;  %s1993_s6 = smov [#allocation13]  }
 0x4ed   :  { %v2485_v23 = vsub.f32 %v2394_v26, %v1099_v21  ;;  %1173 = vadd.xlane.f32.xlu1 %v1146_v27  ;;  %v1082_v40 = vpop.xlane.xlu1 %1081  ;;  %s1404_s16 = sshll.u32 %s1993_s6, 4  ;;  %s1405_s16 = int_to_ptr.vmem [resolvable:$true] %s1404_s16 }
 0x4ee   :  { %v1100_v31 = vmul.f32 0.03125, %v1082_v40  ;;  %1167 = vadd.xlane.f32.xlu0 %v1143_v22  ;;  %v1084_v32 = vpop.xlane.xlu0 %1083  ;;  %v1128_v54 = vsel %vm886_vm0, %v2482_v19, 0.0  ;;  %s1930_s21 = scalar_lea.vmem %s1405_s16, 2048  ;;  %p1935_p13 = scmp.lt.s32.totalorder %s1405_s16, %s1405_s16 }
 0x4ef   :  { %v1101_v43 = vmul.f32 0.03125, %v1084_v32  ;;  %v1144_v29 = vmul.f32 %v1128_v54, %v1128_v54  ;;  %v1131_v30 = vsel %vm886_vm0, %v2485_v23, 0.0  ;;  %p1931_p12 = scmp.ne.s32.totalorder %s1405_s16, %s1930_s21  ;;  %p1936_p0 = scmp.lt.s32.totalorder %s1930_s21, %s1930_s21 }
 0x4f0   :  { %v2494_v46 = vsub.f32 %v2402_v37, %v1100_v31  ;;  %v1147_v26 = vmul.f32 %v1131_v30, %v1131_v30 }
 0x4f1   :  { %v2497_v14 = vsub.f32 %v2406_v13, %v1101_v43  ;;  %1169 = vadd.xlane.f32.xlu1 %v1144_v29  ;;  %v1086_v47 = vpop.xlane.xlu1 %1085  ;;  %p1937_p1 = por %p1936_p0, %p1935_p13 }
 0x4f2   :  { %v1102_v50 = vmul.f32 0.03125, %v1086_v47  ;;  %1175 = vadd.xlane.f32.xlu0 %v1147_v26  ;;  %v1132_v51 = vsel %vm886_vm0, %v2494_v46, 0.0 }
 0x4f3   :  { %v1148_v33 = vmul.f32 %v1132_v51, %v1132_v51  ;;  %v1133_v53 = vsel %vm886_vm0, %v2497_v14, 0.0  ;;  %p1938_p2 = pnand %p1937_p1, %p1931_p12 }
 0x4f4   :  { %v2506_v37 = vsub.f32 %v2412_v38, %v1102_v50  ;;  %v1149_v56 = vmul.f32 %v1133_v53, %v1133_v53 }
 0x4f5   :  { %1177 = vadd.xlane.f32.xlu1 %v1148_v33 }
 0x4f6   :  { %1179 = vadd.xlane.f32.xlu0 %v1149_v56  ;;  %v1134_v13 = vsel %vm886_vm0, %v2506_v37, 0.0 }
 0x4f7   :  { %v1150_v59 = vmul.f32 %v1134_v13, %v1134_v13 }
 0x4f9   :  { %1181 = vadd.xlane.f32.xlu1 %v1150_v59 }
 0x566   :  { %v1156_v41 = vpop.xlane.xlu0 %1155 }
 0x567   :  { %v1185_v52 = vmul.f32 0.03125, %v1156_v41 }
 0x569   :  { %v1201_v5 = vadd.f32 1e-05, %v1185_v52 }
 0x56a   :  { %v1158_v6 = vpop.xlane.xlu1 %1157 }
 0x56b   :  { %1788 = vrsqrt.f32 %v1201_v5  ;;  %v1186_v28 = vmul.f32 0.03125, %v1158_v6  ;;  %v1152_v45 = vpop.xlane.xlu0 %1151 }
 0x56c   :  { %v1183_v11 = vmul.f32 0.03125, %v1152_v45 }
 0x56d   :  { %v1202_v12 = vadd.f32 1e-05, %v1186_v28 }
 0x56e   :  { %v1199_v38 = vadd.f32 1e-05, %v1183_v11  ;;  %v1154_v58 = vpop.xlane.xlu1 %1153 }
 0x56f   :  { %1790 = vrsqrt.f32 %v1202_v12  ;;  %v1184_v9 = vmul.f32 0.03125, %v1154_v58  ;;  %v1164_v15 = vpop.xlane.xlu0 %1163 }
 0x570   :  { %1792 = vrsqrt.f32 %v1199_v38  ;;  %v1189_v16 = vmul.f32 0.03125, %v1164_v15 }
 0x571   :  { %v1200_v4 = vadd.f32 1e-05, %v1184_v9 }
 0x572   :  { %v1205_v60 = vadd.f32 1e-05, %v1189_v16  ;;  %v1166_v63 = vpop.xlane.xlu1 %1165 }
 0x573   :  { %1794 = vrsqrt.f32 %v1200_v4  ;;  %v1190_v49 = vmul.f32 0.03125, %v1166_v63  ;;  %v1160_v62 = vpop.xlane.xlu0 %1159 }
 0x574   :  { %1796 = vrsqrt.f32 %v1205_v60  ;;  %v1187_v0 = vmul.f32 0.03125, %v1160_v62 }
 0x575   :  { %v1789_v24 = vpop.eup %1788  ;;  %v1206_v1 = vadd.f32 1e-05, %v1190_v49 }
 0x576   :  { %v1233_v42 = vmul.f32 %v1789_v24, %v2416_v39  ;;  %v1203_v48 = vadd.f32 1e-05, %v1187_v0  ;;  %v1162_v10 = vpop.xlane.xlu1 %1161 }
 0x577   :  { %1798 = vrsqrt.f32 %v1206_v1  ;;  %v1188_v36 = vmul.f32 0.03125, %v1162_v10  ;;  %v1172_v2 = vpop.xlane.xlu0 %1171 }
 0x578   :  { %v1253_v21 = vmul.f32 %v2514_v25, %v1233_v42  ;;  %1800 = vrsqrt.f32 %v1203_v48  ;;  %v1193_v27 = vmul.f32 0.03125, %v1172_v2 }
 0x579   :  { %v1791_v61 = vpop.eup %1790  ;;  %v1204_v22 = vadd.f32 1e-05, %v1188_v36 }
 0x57a   :  { %v1793_v40 = vpop.eup %1792  ;;  %v1273_v31 = vadd.f32 %v2520_v34, %v1253_v21  ;;  %v1234_v39 = vmul.f32 %v1791_v61, %v2422_v44  ;;  %v1209_v32 = vadd.f32 1e-05, %v1193_v27  ;;  %v1174_v54 = vpop.xlane.xlu1 %1173 }
 0x57b   :  { %v1231_v43 = vmul.f32 %v1793_v40, %v2425_v3  ;;  %1802 = vrsqrt.f32 %v1204_v22  ;;  %v1194_v29 = vmul.f32 0.03125, %v1174_v54  ;;  %v1168_v30 = vpop.xlane.xlu0 %1167 }
 0x57c   :  { %v1289_v26 = vmax.f32 %v1273_v31, 0.0  ;;  %v1254_v47 = vmul.f32 %v2514_v25, %v1234_v39  ;;  %1804 = vrsqrt.f32 %v1209_v32  ;;  %v1191_v50 = vmul.f32 0.03125, %v1168_v30 }
 0x57d   :  { %v1795_v51 = vpop.eup %1794  ;;  %v1251_v33 = vmul.f32 %v2514_v25, %v1231_v43  ;;  %v1210_v53 = vadd.f32 1e-05, %v1194_v29 }
 0x57e   :  { %v1797_v56 = vpop.eup %1796  ;;  %1305 = vst [vmem:[#allocation13 + $0x10] sm:$0xff] %v1289_v26  ;;  %v1274_v44 = vadd.f32 %v2520_v34, %v1254_v47  ;;  %v1232_v13 = vmul.f32 %v1795_v51, %v2434_v17  ;;  %v1207_v59 = vadd.f32 1e-05, %v1191_v50  ;;  %v1170_v3 = vpop.xlane.xlu1 %1169 }
 0x57f   :  { %v1271_v41 = vadd.f32 %v2520_v34, %v1251_v33  ;;  %v1237_v52 = vmul.f32 %v1797_v56, %v2437_v35  ;;  %1806 = vrsqrt.f32 %v1210_v53  ;;  %v1192_v5 = vmul.f32 0.03125, %v1170_v3  ;;  %v1176_v6 = vpop.xlane.xlu0 %1175 }
 0x580   :  { %v1290_v28 = vmax.f32 %v1274_v44, 0.0  ;;  %v1252_v45 = vmul.f32 %v2514_v25, %v1232_v13  ;;  %1808 = vrsqrt.f32 %v1207_v59  ;;  %v1195_v11 = vmul.f32 0.03125, %v1176_v6 }
 0x581   :  { %v1799_v12 = vpop.eup %1798  ;;  %v1287_v38 = vmax.f32 %v1271_v41, 0.0  ;;  %v1257_v58 = vmul.f32 %v2514_v25, %v1237_v52  ;;  %v1208_v9 = vadd.f32 1e-05, %v1192_v5 }
 0x582   :  { %v1801_v17 = vpop.eup %1800  ;;  %1306 = vst [vmem:[#allocation13 + $0x18] sm:$0xff] %v1290_v28  ;;  %v1514_v15 = vpack.c.bf16 %v1290_v28, %v1289_v26  ;;  %v1272_v16 = vadd.f32 %v2520_v34, %v1252_v45  ;;  %v1238_v35 = vmul.f32 %v1799_v12, %v2446_v7  ;;  %v1211_v4 = vadd.f32 1e-05, %v1195_v11  ;;  %v1178_v60 = vpop.xlane.xlu1 %1177 }
 0x583   :  { %1303 = vst [vmem:[#allocation13] sm:$0xff] %v1287_v38  ;;  %v1277_v63 = vadd.f32 %v2520_v34, %v1257_v58  ;;  %v1235_v49 = vmul.f32 %v1801_v17, %v2449_v8  ;;  %1810 = vrsqrt.f32 %v1208_v9  ;;  %v1196_v62 = vmul.f32 0.03125, %v1178_v60  ;;  %v1180_v0 = vpop.xlane.xlu0 %1179 }
 0x584   :  { %1546 = vst [vmem:[#allocation14 + $0x8] sm:$0xff] %v1514_v15   ;;  %v1288_v24 = vmax.f32 %v1272_v16, 0.0  ;;  %v1258_v1 = vmul.f32 %v2514_v25, %v1238_v35  ;;  %1812 = vrsqrt.f32 %v1211_v4  ;;  %v1197_v42 = vmul.f32 0.03125, %v1180_v0 }
 0x585   :  { %v1803_v48 = vpop.eup %1802  ;;  %v1293_v10 = vmax.f32 %v1277_v63, 0.0  ;;  %v1255_v7 = vmul.f32 %v2514_v25, %v1235_v49  ;;  %v1212_v36 = vadd.f32 1e-05, %v1196_v62 }
 0x586   :  { %v1805_v2 = vpop.eup %1804  ;;  %1304 = vst [vmem:[#allocation13 + $0x8] sm:$0xff] %v1288_v24  ;;  %v1509_v21 = vpack.c.bf16 %v1288_v24, %v1287_v38  ;;  %v1278_v27 = vadd.f32 %v2520_v34, %v1258_v1  ;;  %v1236_v8 = vmul.f32 %v1803_v48, %v2458_v18  ;;  %v1213_v61 = vadd.f32 1e-05, %v1197_v42  ;;  %v1182_v22 = vpop.xlane.xlu1 %1181 }
 0x587   :  { %1309 = vst [vmem:[#allocation13 + $0x30] sm:$0xff] %v1293_v10  ;;  %v1275_v40 = vadd.f32 %v2520_v34, %v1255_v7  ;;  %v1241_v31 = vmul.f32 %v1805_v2, %v2461_v20  ;;  %1814 = vrsqrt.f32 %v1212_v36  ;;  %v1198_v39 = vmul.f32 0.03125, %v1182_v22 }
 0x588   :  { %1510 = vst [vmem:[#allocation14] sm:$0xff] %v1509_v21   ;;  %v1294_v32 = vmax.f32 %v1278_v27, 0.0  ;;  %v1256_v54 = vmul.f32 %v2514_v25, %v1236_v8  ;;  %1816 = vrsqrt.f32 %v1213_v61 }
 0x589   :  { %v1807_v43 = vpop.eup %1806  ;;  %v1291_v29 = vmax.f32 %v1275_v40, 0.0  ;;  %v1261_v30 = vmul.f32 %v2514_v25, %v1241_v31  ;;  %v1214_v26 = vadd.f32 1e-05, %v1198_v39 }
 0x58a   :  { %v1809_v18 = vpop.eup %1808  ;;  %1310 = vst [vmem:[#allocation13 + $0x38] sm:$0xff] %v1294_v32  ;;  %v1524_v47 = vpack.c.bf16 %v1294_v32, %v1293_v10  ;;  %v1276_v50 = vadd.f32 %v2520_v34, %v1256_v54  ;;  %v1242_v51 = vmul.f32 %v1807_v43, %v2470_v55 }
 0x58b   :  { %1307 = vst [vmem:[#allocation13 + $0x20] sm:$0xff] %v1291_v29  ;;  %v1281_v20 = vadd.f32 %v2520_v34, %v1261_v30  ;;  %v1239_v33 = vmul.f32 %v1809_v18, %v2473_v57  ;;  %1818 = vrsqrt.f32 %v1214_v26 }
 0x58c   :  { %1548 = vst [vmem:[#allocation14 + $0x18] sm:$0xff] %v1524_v47   ;;  %v1292_v53 = vmax.f32 %v1276_v50, 0.0  ;;  %v1262_v56 = vmul.f32 %v2514_v25, %v1242_v51 }
 0x58d   :  { %v1811_v44 = vpop.eup %1810  ;;  %v1297_v13 = vmax.f32 %v1281_v20, 0.0  ;;  %v1259_v59 = vmul.f32 %v2514_v25, %v1239_v33 }
 0x58e   :  { %v1813_v3 = vpop.eup %1812  ;;  %1308 = vst [vmem:[#allocation13 + $0x28] sm:$0xff] %v1292_v53  ;;  %v1519_v41 = vpack.c.bf16 %v1292_v53, %v1291_v29  ;;  %v1282_v52 = vadd.f32 %v2520_v34, %v1262_v56  ;;  %v1240_v55 = vmul.f32 %v1811_v44, %v2482_v19 }
 0x58f   :  { %1313 = vst [vmem:[#allocation13 + $0x50] sm:$0xff] %v1297_v13  ;;  %v1279_v5 = vadd.f32 %v2520_v34, %v1259_v59  ;;  %v1243_v57 = vmul.f32 %v1813_v3, %v2485_v23 }
 0x590   :  { %1547 = vst [vmem:[#allocation14 + $0x10] sm:$0xff] %v1519_v41   ;;  %v1298_v6 = vmax.f32 %v1282_v52, 0.0  ;;  %v1260_v28 = vmul.f32 %v2514_v25, %v1240_v55 }
 0x591   :  { %v1815_v45 = vpop.eup %1814  ;;  %v1295_v11 = vmax.f32 %v1279_v5, 0.0  ;;  %v1263_v12 = vmul.f32 %v2514_v25, %v1243_v57 }
 0x592   :  { %v1817_v38 = vpop.eup %1816  ;;  %1314 = vst [vmem:[#allocation13 + $0x58] sm:$0xff] %v1298_v6  ;;  %v1534_v58 = vpack.c.bf16 %v1298_v6, %v1297_v13  ;;  %v1280_v9 = vadd.f32 %v2520_v34, %v1260_v28  ;;  %v1244_v19 = vmul.f32 %v1815_v45, %v2494_v46 }
 0x593   :  { %1311 = vst [vmem:[#allocation13 + $0x40] sm:$0xff] %v1295_v11  ;;  %v1283_v17 = vadd.f32 %v2520_v34, %v1263_v12  ;;  %v1245_v23 = vmul.f32 %v1817_v38, %v2497_v14 }
 0x594   :  { %1550 = vst [vmem:[#allocation14 + $0x28] sm:$0xff] %v1534_v58   ;;  %v1296_v15 = vmax.f32 %v1280_v9, 0.0  ;;  %v1264_v16 = vmul.f32 %v2514_v25, %v1244_v19 }
 0x595   :  { %v1819_v35 = vpop.eup %1818  ;;  %v1299_v4 = vmax.f32 %v1283_v17, 0.0  ;;  %v1265_v60 = vmul.f32 %v2514_v25, %v1245_v23 }
 0x596   :  { %1312 = vst [vmem:[#allocation13 + $0x48] sm:$0xff] %v1296_v15  ;;  %v1529_v63 = vpack.c.bf16 %v1296_v15, %v1295_v11  ;;  %v1284_v49 = vadd.f32 %v2520_v34, %v1264_v16  ;;  %v1246_v62 = vmul.f32 %v1819_v35, %v2506_v37 }
 0x597   :  { %1315 = vst [vmem:[#allocation13 + $0x60] sm:$0xff] %v1299_v4  ;;  %v1285_v46 = vadd.f32 %v2520_v34, %v1265_v60 }
 0x598   :  { %1549 = vst [vmem:[#allocation14 + $0x20] sm:$0xff] %v1529_v63   ;;  %v1300_v0 = vmax.f32 %v1284_v49, 0.0  ;;  %v1266_v14 = vmul.f32 %v2514_v25, %v1246_v62 }
 0x599   :  { %v1301_v24 = vmax.f32 %v1285_v46, 0.0 }
 0x59a   :  { %1316 = vst [vmem:[#allocation13 + $0x68] sm:$0xff] %v1300_v0  ;;  %v1539_v1 = vpack.c.bf16 %v1300_v0, %v1299_v4  ;;  %v1286_v42 = vadd.f32 %v2520_v34, %v1266_v14 }
 0x59b   :  { %1317 = vst [vmem:[#allocation13 + $0x70] sm:$0xff] %v1301_v24 }
 0x59c   :  { %1551 = vst [vmem:[#allocation14 + $0x30] sm:$0xff] %v1539_v1   ;;  %v1302_v48 = vmax.f32 %v1286_v42, 0.0 }
 0x59e   :  { %1318 = vst [vmem:[#allocation13 + $0x78] sm:$0xff] %v1302_v48  ;;  %v1544_v37 = vpack.c.bf16 %v1302_v48, %v1301_v24 }
 0x59f   :  { %1941 = shalt.err (!%p1938_p2)
}
 0x5a0   :  { %s1942_s22 = scalar_lea.hbm %s2613_s7, 2048 }
 0x5a1   :  { %p1943_p3 = scmp.ne.s32.totalorder %s2613_s7, %s1942_s22  ;;  %p1946_p4 = scmp.lt.u32.totalorder %s1942_s22, %s2613_s7 }
 0x5a3   :  { %p1948_p5 = pnand %p1946_p4, %p1943_p3 }
 0x5a5   :  { %1951 = shalt.err (!%p1948_p5)
}
 0x5a6   :  { %1410 = dma.vmem_to_hbm [thread:$0]  %s1405_s16, 2048, %s2613_s7, [#allocation6], %s1990_s1, %s1990_s1, %s1991_s9   ;;  %1552 = vst [vmem:[#allocation14 + $0x38] sm:$0xff] %v1544_v37  }
 0x5a7   :  { %s1952_s25 = scalar_lea.vmem %s2569_s20, 1024  ;;  %p1957_p7 = scmp.lt.s32.totalorder %s2569_s20, %s2569_s20 }
 0x5a8   :  { %p1953_p6 = scmp.ne.s32.totalorder %s2569_s20, %s1952_s25  ;;  %p1958_p8 = scmp.lt.s32.totalorder %s1952_s25, %s1952_s25 }
 0x5aa   :  { %p1959_p9 = por %p1958_p8, %p1957_p7 }
 0x5ac   :  { %p1960_p10 = pnand %p1959_p9, %p1953_p6 }
 0x5ae   :  { %1963 = shalt.err (!%p1960_p10)
}
 0x5af   :  { %s1964_s29 = scalar_lea.hbm %s2614_s8, 1024 }
 0x5b0   :  { %p1965_p11 = scmp.ne.s32.totalorder %s2614_s8, %s1964_s29  ;;  %p1968_p12 = scmp.lt.u32.totalorder %s1964_s29, %s2614_s8 }
 0x5b2   :  { %p1970_p13 = pnand %p1968_p12, %p1965_p11 }
 0x5b4   :  { %1973 = shalt.err (!%p1970_p13)
}
 0x5b5   :  { %1422 = dma.vmem_to_hbm [thread:$0]  %s2569_s20, 1024, %s2614_s8, [#allocation15], %s1986_s17, %s1986_s17, %s1987_s18  }
 0x5b6   :  { %1980 = dma.done.wait [#allocation6], 2048  }
 0x5b7   :  { %1981 = vsyncadd [#allocation6], 4294965248 }
 0x5b8   :  { %1982 = dma.done.wait [#allocation15], 1024  }
 0x5b9   :  { %1983 = vsyncadd [#allocation15], 4294966272 }
 0x5ba   :  { %1429 = vsyncpa [#allocation5], 1 }
 0x5bb   :  { %1430 = vsyncpa [#allocation8], 1 }
 0x5bc   :  { %1431 = vsyncpa [#allocation11], 1 }
 0x5bd   :  { %1432 = vsyncpa [#allocation6], 1 }
 0x5be   :  { %1433 = vsyncpa [#allocation15], 1 }

</bundles_post_ra>
